<compile_context>
chip_gen: v5e
topology: v5e:2x2
jax: 0.10.0
libtpu: 0.0.40
codegen_flags: <defaults>
</compile_context>

<pallas_src>
import math

import numpy as np
import jax
import jax.numpy as jnp
from jax.experimental import pallas as pl
from jax.experimental.pallas import tpu as pltpu


# ----------------------------- module "parameters" -----------------------------

def get_index(M, rho):
    S = []
    for n1 in range(-(M // 2), M // 2):
        for n2 in range(-(M // 2), M // 2):
            if abs(n1 * n2) <= rho * (M // 2):
                S.append((n1, n2))
    return S


def get_power(task_info, Nmodes):
    # dBm -> linear power per mode (assumed pkufiber.get_power form).
    return 10.0 ** (task_info[:, 0] / 10.0) / Nmodes


# --------------------------------- Pallas kernel --------------------------------

def _make_kernel(index_sorted, Nmodes, Bt, L):
    """Per-grid-step frequency-domain PBC accumulation on packed planes.

    Tile layout (sublane-major): rows [0:NB]   = Re{FFT(x)}, mode-major
                                 rows [NB:2NB] = Im{FFT(x)}, mode-major
    where NB = Nmodes * Bt and within each plane rows are
    [mode 0: batches 0..Bt-1, mode 1: batches 0..Bt-1, ...].

    `index_sorted` must be n2-major so each n2 group shares the mode-swap, the
    roll(X, n2) and the final complex multiply-accumulate.
    """
    NB = Nmodes * Bt

    # n2-major groups, built at trace time: [(n2, [(k, n1), ...]), ...]
    groups = []
    for k, (n1, n2) in enumerate(index_sorted):
        if not groups or groups[-1][0] != n2:
            groups.append((n2, []))
        groups[-1][1].append((k, n1))

    def roll_l(a, n):
        # torch.roll / np.roll semantics along the lane (frequency) axis.
        s = n % L
        if s == 0:
            return a
        return pltpu.roll(a, s, 1)          # XLU lane rotation (vector-extended slot)

    def kernel(w_re_ref, w_im_ref, x_ref, o_ref):
        xr = x_ref[:NB, :]                  # (NB, L) Re plane
        xi = x_ref[NB:, :]                  # (NB, L) Im plane

        acc_r = None
        acc_i = None
        for n2, members in groups:
            # G(n2) = sum_{n1} w_k * roll(X, n1) * conj(roll(X, n1 + n2))
            g_r = None
            g_i = None
            for k, n1 in members:
                p_r, p_i = roll_l(xr, n1), roll_l(xi, n1)
                q_r, q_i = roll_l(xr, n1 + n2), roll_l(xi, n1 + n2)
                a_r = p_r * q_r + p_i * q_i            # A = p * conj(q)
                a_i = p_i * q_r - p_r * q_i
                w_r = w_re_ref[k]                      # SMEM scalars (no jnp.full)
                w_i = w_im_ref[k]
                c_r = w_r * a_r - w_i * a_i
                c_i = w_r * a_i + w_i * a_r
                g_r = c_r if g_r is None else g_r + c_r
                g_i = c_i if g_i is None else g_i + c_i

            # B = G + roll(G, 1, modes).  Rows are mode-major, so the mode roll is
            # a sublane block rotation by Bt rows within the NB-row plane only.
            if Nmodes == 1:
                b_r, b_i = g_r + g_r, g_i + g_i
            else:
                b_r = g_r + pltpu.roll(g_r, Bt, 0)
                b_i = g_i + pltpu.roll(g_i, Bt, 0)

            # Single complex MAC with roll(X, n2) per group.
            r_r, r_i = roll_l(xr, n2), roll_l(xi, n2)
            t_r = b_r * r_r - b_i * r_i
            t_i = b_r * r_i + b_i * r_r
            acc_r = t_r if acc_r is None else acc_r + t_r
            acc_i = t_i if acc_i is None else acc_i + t_i

        o_ref[:NB, :] = acc_r               # direct plane slice stores (no concat)
        o_ref[NB:, :] = acc_i

    return kernel


# --------------------------------- JAX wrapper -----------------------------------

def _choose_bt(B, Nmodes, L):
    """Batches per grid step: 8-row aligned planes, tiles big enough to amortize
    per-step overhead, per-tile VMEM capped at ~4 MiB (v7x budget), and >= 2 grid
    steps when the batch allows (v7x megacore)."""
    base = math.lcm(8, Nmodes) // Nmodes                 # min batches for 8-row planes
    nb_vmem_cap = max(8, (4 << 20) // (2 * L * 4))       # rows s.t. 2*NB*L*4 <= 4 MiB
    nb_target = min(64, nb_vmem_cap)
    c = max(1, nb_target // (Nmodes * base))
    c = min(c, max(1, -(-B // base)))                    # don't pad past one tile of B
    while c > 1 and B > base and -(-B // (c * base)) < 2:
        c -= 1                                           # keep G >= 2 if possible
    return c * base


def eq_fre_pbc_forward(x, task_info, w, *, M, overlaps, rho=-1.0):
    """x: [B, L, Nmodes] complex64, task_info: [B, 4] f32, w: [K] complex64
       -> [B, L - overlaps, Nmodes] complex64"""
    B, L, Nmodes = x.shape
    rho_v = rho if rho > 0 else M / 2
    index = get_index(M, rho_v)
    K = len(index)
    assert w.shape == (K,)

    P = get_power(task_info, Nmodes).astype(jnp.float32)

    # n2-major ordering so the kernel shares work per n2 group; permute w identically.
    order = sorted(range(K), key=lambda t: (index[t][1], index[t][0]))
    index_sorted = [index[t] for t in order]
    perm = np.asarray(order, dtype=np.int32)
    w_re = jnp.real(w).astype(jnp.float32)[perm]
    w_im = jnp.imag(w).astype(jnp.float32)[perm]

    # Pack Bt batches x Nmodes modes onto the sublane axis (full vreg occupancy).
    Bt = _choose_bt(B, Nmodes, L)
    NB = Nmodes * Bt
    G = -(-B // Bt)                     # grid steps
    Bp = G * Bt

    xf = jnp.fft.fft(x, axis=1)                      # [B, L, Nmodes]
    xf_t = jnp.transpose(xf, (0, 2, 1))              # [B, Nmodes, L]
    if Bp != B:
        xf_t = jnp.pad(xf_t, ((0, Bp - B), (0, 0), (0, 0)))

    # (G, Bt, Nmodes, L) -> mode-major rows per tile -> (G, NB, L)
    xg = jnp.transpose(xf_t.reshape(G, Bt, Nmodes, L), (0, 2, 1, 3)).reshape(G, NB, L)
    xr = jnp.real(xg).astype(jnp.float32)
    xi = jnp.imag(xg).astype(jnp.float32)
    packed = jnp.concatenate([xr, xi], axis=1).reshape(G * 2 * NB, L)   # one input array

    kernel = _make_kernel(index_sorted, Nmodes, Bt, L)
    data_spec = pl.BlockSpec((2 * NB, L), lambda g: (g, 0))
    smem_spec = pl.BlockSpec(memory_space=pltpu.MemorySpace.SMEM)

    tile_bytes = 2 * NB * L * 4
    vmem_limit = int(min(100 << 20, max(32 << 20, 16 * tile_bytes)))

    out_planes = pl.pallas_call(
        kernel,
        out_shape=jax.ShapeDtypeStruct((G * 2 * NB, L), jnp.float32),
        grid_spec=pltpu.PrefetchScalarGridSpec(
            num_scalar_prefetch=0,
            grid=(G,),
            in_specs=[smem_spec, smem_spec, data_spec],
            out_specs=data_spec),
        compiler_params=pltpu.CompilerParams(
            dimension_semantics=("parallel",),
            vmem_limit_bytes=vmem_limit),
    )(w_re, w_im, packed)

    # Unpack (G, 2, Nmodes, Bt, L) -> complex delta in the original [B, L, Nmodes].
    o = out_planes.reshape(G, 2, Nmodes, Bt, L)
    delta = (o[:, 0] + 1j * o[:, 1]).astype(jnp.complex64)      # (G, Nmodes, Bt, L)
    delta = jnp.transpose(delta, (0, 2, 1, 3)).reshape(Bp, Nmodes, L)[:B]
    delta = jnp.transpose(delta, (0, 2, 1))                     # (B, L, Nmodes)
    delta = jnp.fft.ifft(delta, axis=1)
    out = x + delta * P[:, None, None]
    return out[:, overlaps // 2: L - overlaps // 2, :]


# ------------------------------ pure-JAX reference -------------------------------

def eq_fre_pbc_reference(x, task_info, w, *, M, overlaps, rho=-1.0):
    B, L, Nmodes = x.shape
    rho_v = rho if rho > 0 else M / 2
    index = get_index(M, rho_v)
    P = get_power(task_info, Nmodes)
    xf = jnp.fft.fft(x, axis=1)
    E3 = []
    for n1, n2 in index:
        A = jnp.roll(xf, n1, axis=1) * jnp.conj(jnp.roll(xf, n1 + n2, axis=1))
        E3.append((A + jnp.roll(A, 1, axis=-1)) * jnp.roll(xf, n2, axis=1))
    E = jnp.stack(E3, axis=-1)                        # [B, L, Nmodes, K]
    delta = jnp.einsum("blmk,k->blm", E, w)           # ComplexLinear(K, 1), no bias
    delta = jnp.fft.ifft(delta, axis=1)
    return (x + delta * P[:, None, None])[:, overlaps // 2: L - overlaps // 2, :]


# ------------------------------------- main ---------------------------------------

def _run_case(key, *, B, L, Nmodes, M, overlaps, rho=-1.0):
    index = get_index(M, rho if rho > 0 else M / 2)
    K = len(index)
    kxr, kxi, kt, kwr, kwi = jax.random.split(key, 5)
    x = (jax.random.normal(kxr, (B, L, Nmodes), jnp.float32)
         + 1j * jax.random.normal(kxi, (B, L, Nmodes), jnp.float32)).astype(jnp.complex64)
    task_info = jax.random.uniform(kt, (B, 4), jnp.float32, minval=-1.0, maxval=2.0)
    # Deterministic synthetic ComplexLinear(K, 1) weight.
    w = ((jax.random.normal(kwr, (K,), jnp.float32)
          + 1j * jax.random.normal(kwi, (K,), jnp.float32)) * 0.01).astype(jnp.complex64)

    out = jax.block_until_ready(
        eq_fre_pbc_forward(x, task_info, w, M=M, overlaps=overlaps, rho=rho))
    ref = jax.block_until_ready(
        eq_fre_pbc_reference(x, task_info, w, M=M, overlaps=overlaps, rho=rho))

    assert out.shape == (B, L - overlaps, Nmodes), out.shape
    np.testing.assert_allclose(np.asarray(out), np.asarray(ref), rtol=2e-3, atol=2e-3)


if __name__ == "__main__":
    key = jax.random.PRNGKey(0)
    k1, k2 = jax.random.split(key)
    # dual-pol, L = a single 128-lane column (mode-swap path exercised)
    _run_case(k1, B=2, L=128, Nmodes=2, M=7, overlaps=4)
    # single-pol, L = 256 so lane rolls wrap across a 128-lane boundary, padded batch
    _run_case(k2, B=3, L=256, Nmodes=1, M=5, overlaps=6)
    print("KERNEL_OK")
</pallas_src>

<mosaic_0001>
module attributes {stable_mosaic.version = 11 : i64} {
  func.func @kernel(%arg0: i32, %arg1: memref<36xf32, #tpu.memory_space<smem>>, %arg2: memref<36xf32, #tpu.memory_space<smem>>, %arg3: memref<16x128xf32, #tpu.memory_space<vmem>>, %arg4: memref<16x128xf32, #tpu.memory_space<vmem>>) attributes {dimension_semantics = [#tpu.dimension_semantics<parallel>], iteration_bounds = array<i64: 1>, scalar_prefetch = 0 : i64, scratch_operands = 0 : i64, tpu.core_type = #tpu.core_type<tc>, window_params = [{transform_indices = @transform_0, window_bounds = array<i64: 36>}, {transform_indices = @transform_1, window_bounds = array<i64: 36>}, {transform_indices = @transform_2, window_bounds = array<i64: 16, 128>}, {transform_indices = @transform_3, window_bounds = array<i64: 16, 128>}]} {
    %c0 = arith.constant 0 : index
    %c0_0 = arith.constant 0 : index
    %0 = vector.load %arg3[%c0, %c0_0] : memref<16x128xf32, #tpu.memory_space<vmem>>, vector<8x128xf32>
    %c8 = arith.constant 8 : index
    %c0_1 = arith.constant 0 : index
    %1 = vector.load %arg3[%c8, %c0_1] : memref<16x128xf32, #tpu.memory_space<vmem>>, vector<8x128xf32>
    %c125_i32 = arith.constant 125 : i32
    %2 = tpu.dynamic_rotate %0 by %c125_i32 dim 1 : vector<8x128xf32>, i32 -> vector<8x128xf32>
    %c125_i32_2 = arith.constant 125 : i32
    %3 = tpu.dynamic_rotate %1 by %c125_i32_2 dim 1 : vector<8x128xf32>, i32 -> vector<8x128xf32>
    %c122_i32 = arith.constant 122 : i32
    %4 = tpu.dynamic_rotate %0 by %c122_i32 dim 1 : vector<8x128xf32>, i32 -> vector<8x128xf32>
    %c122_i32_3 = arith.constant 122 : i32
    %5 = tpu.dynamic_rotate %1 by %c122_i32_3 dim 1 : vector<8x128xf32>, i32 -> vector<8x128xf32>
    %6 = arith.mulf %2, %4 : vector<8x128xf32>
    %7 = arith.mulf %3, %5 : vector<8x128xf32>
    %8 = arith.addf %6, %7 : vector<8x128xf32>
    %9 = arith.mulf %3, %4 : vector<8x128xf32>
    %10 = arith.mulf %2, %5 : vector<8x128xf32>
    %11 = arith.subf %9, %10 : vector<8x128xf32>
    %c0_4 = arith.constant 0 : index
    %12 = memref.load %arg1[%c0_4] : memref<36xf32, #tpu.memory_space<smem>>
    %c0_5 = arith.constant 0 : index
    %13 = memref.load %arg2[%c0_5] : memref<36xf32, #tpu.memory_space<smem>>
    %14 = vector.broadcast %12 : f32 to vector<8x128xf32>
    %15 = arith.mulf %14, %8 : vector<8x128xf32>
    %16 = vector.broadcast %13 : f32 to vector<8x128xf32>
    %17 = arith.mulf %16, %11 : vector<8x128xf32>
    %18 = arith.subf %15, %17 : vector<8x128xf32>
    %19 = vector.broadcast %12 : f32 to vector<8x128xf32>
    %20 = arith.mulf %19, %11 : vector<8x128xf32>
    %21 = vector.broadcast %13 : f32 to vector<8x128xf32>
    %22 = arith.mulf %21, %8 : vector<8x128xf32>
    %23 = arith.addf %20, %22 : vector<8x128xf32>
    %c126_i32 = arith.constant 126 : i32
    %24 = tpu.dynamic_rotate %0 by %c126_i32 dim 1 : vector<8x128xf32>, i32 -> vector<8x128xf32>
    %c126_i32_6 = arith.constant 126 : i32
    %25 = tpu.dynamic_rotate %1 by %c126_i32_6 dim 1 : vector<8x128xf32>, i32 -> vector<8x128xf32>
    %c123_i32 = arith.constant 123 : i32
    %26 = tpu.dynamic_rotate %0 by %c123_i32 dim 1 : vector<8x128xf32>, i32 -> vector<8x128xf32>
    %c123_i32_7 = arith.constant 123 : i32
    %27 = tpu.dynamic_rotate %1 by %c123_i32_7 dim 1 : vector<8x128xf32>, i32 -> vector<8x128xf32>
    %28 = arith.mulf %24, %26 : vector<8x128xf32>
    %29 = arith.mulf %25, %27 : vector<8x128xf32>
    %30 = arith.addf %28, %29 : vector<8x128xf32>
    %31 = arith.mulf %25, %26 : vector<8x128xf32>
    %32 = arith.mulf %24, %27 : vector<8x128xf32>
    %33 = arith.subf %31, %32 : vector<8x128xf32>
    %c1 = arith.constant 1 : index
    %34 = memref.load %arg1[%c1] : memref<36xf32, #tpu.memory_space<smem>>
    %c1_8 = arith.constant 1 : index
    %35 = memref.load %arg2[%c1_8] : memref<36xf32, #tpu.memory_space<smem>>
    %36 = vector.broadcast %34 : f32 to vector<8x128xf32>
    %37 = arith.mulf %36, %30 : vector<8x128xf32>
    %38 = vector.broadcast %35 : f32 to vector<8x128xf32>
    %39 = arith.mulf %38, %33 : vector<8x128xf32>
    %40 = arith.subf %37, %39 : vector<8x128xf32>
    %41 = vector.broadcast %34 : f32 to vector<8x128xf32>
    %42 = arith.mulf %41, %33 : vector<8x128xf32>
    %43 = vector.broadcast %35 : f32 to vector<8x128xf32>
    %44 = arith.mulf %43, %30 : vector<8x128xf32>
    %45 = arith.addf %42, %44 : vector<8x128xf32>
    %46 = arith.addf %18, %40 : vector<8x128xf32>
    %47 = arith.addf %23, %45 : vector<8x128xf32>
    %c127_i32 = arith.constant 127 : i32
    %48 = tpu.dynamic_rotate %0 by %c127_i32 dim 1 : vector<8x128xf32>, i32 -> vector<8x128xf32>
    %c127_i32_9 = arith.constant 127 : i32
    %49 = tpu.dynamic_rotate %1 by %c127_i32_9 dim 1 : vector<8x128xf32>, i32 -> vector<8x128xf32>
    %c124_i32 = arith.constant 124 : i32
    %50 = tpu.dynamic_rotate %0 by %c124_i32 dim 1 : vector<8x128xf32>, i32 -> vector<8x128xf32>
    %c124_i32_10 = arith.constant 124 : i32
    %51 = tpu.dynamic_rotate %1 by %c124_i32_10 dim 1 : vector<8x128xf32>, i32 -> vector<8x128xf32>
    %52 = arith.mulf %48, %50 : vector<8x128xf32>
    %53 = arith.mulf %49, %51 : vector<8x128xf32>
    %54 = arith.addf %52, %53 : vector<8x128xf32>
    %55 = arith.mulf %49, %50 : vector<8x128xf32>
    %56 = arith.mulf %48, %51 : vector<8x128xf32>
    %57 = arith.subf %55, %56 : vector<8x128xf32>
    %c2 = arith.constant 2 : index
    %58 = memref.load %arg1[%c2] : memref<36xf32, #tpu.memory_space<smem>>
    %c2_11 = arith.constant 2 : index
    %59 = memref.load %arg2[%c2_11] : memref<36xf32, #tpu.memory_space<smem>>
    %60 = vector.broadcast %58 : f32 to vector<8x128xf32>
    %61 = arith.mulf %60, %54 : vector<8x128xf32>
    %62 = vector.broadcast %59 : f32 to vector<8x128xf32>
    %63 = arith.mulf %62, %57 : vector<8x128xf32>
    %64 = arith.subf %61, %63 : vector<8x128xf32>
    %65 = vector.broadcast %58 : f32 to vector<8x128xf32>
    %66 = arith.mulf %65, %57 : vector<8x128xf32>
    %67 = vector.broadcast %59 : f32 to vector<8x128xf32>
    %68 = arith.mulf %67, %54 : vector<8x128xf32>
    %69 = arith.addf %66, %68 : vector<8x128xf32>
    %70 = arith.addf %46, %64 : vector<8x128xf32>
    %71 = arith.addf %47, %69 : vector<8x128xf32>
    %c125_i32_12 = arith.constant 125 : i32
    %72 = tpu.dynamic_rotate %0 by %c125_i32_12 dim 1 : vector<8x128xf32>, i32 -> vector<8x128xf32>
    %c125_i32_13 = arith.constant 125 : i32
    %73 = tpu.dynamic_rotate %1 by %c125_i32_13 dim 1 : vector<8x128xf32>, i32 -> vector<8x128xf32>
    %74 = arith.mulf %0, %72 : vector<8x128xf32>
    %75 = arith.mulf %1, %73 : vector<8x128xf32>
    %76 = arith.addf %74, %75 : vector<8x128xf32>
    %77 = arith.mulf %1, %72 : vector<8x128xf32>
    %78 = arith.mulf %0, %73 : vector<8x128xf32>
    %79 = arith.subf %77, %78 : vector<8x128xf32>
    %c3 = arith.constant 3 : index
    %80 = memref.load %arg1[%c3] : memref<36xf32, #tpu.memory_space<smem>>
    %c3_14 = arith.constant 3 : index
    %81 = memref.load %arg2[%c3_14] : memref<36xf32, #tpu.memory_space<smem>>
    %82 = vector.broadcast %80 : f32 to vector<8x128xf32>
    %83 = arith.mulf %82, %76 : vector<8x128xf32>
    %84 = vector.broadcast %81 : f32 to vector<8x128xf32>
    %85 = arith.mulf %84, %79 : vector<8x128xf32>
    %86 = arith.subf %83, %85 : vector<8x128xf32>
    %87 = vector.broadcast %80 : f32 to vector<8x128xf32>
    %88 = arith.mulf %87, %79 : vector<8x128xf32>
    %89 = vector.broadcast %81 : f32 to vector<8x128xf32>
    %90 = arith.mulf %89, %76 : vector<8x128xf32>
    %91 = arith.addf %88, %90 : vector<8x128xf32>
    %92 = arith.addf %70, %86 : vector<8x128xf32>
    %93 = arith.addf %71, %91 : vector<8x128xf32>
    %c1_i32 = arith.constant 1 : i32
    %94 = tpu.dynamic_rotate %0 by %c1_i32 dim 1 : vector<8x128xf32>, i32 -> vector<8x128xf32>
    %c1_i32_15 = arith.constant 1 : i32
    %95 = tpu.dynamic_rotate %1 by %c1_i32_15 dim 1 : vector<8x128xf32>, i32 -> vector<8x128xf32>
    %c126_i32_16 = arith.constant 126 : i32
    %96 = tpu.dynamic_rotate %0 by %c126_i32_16 dim 1 : vector<8x128xf32>, i32 -> vector<8x128xf32>
    %c126_i32_17 = arith.constant 126 : i32
    %97 = tpu.dynamic_rotate %1 by %c126_i32_17 dim 1 : vector<8x128xf32>, i32 -> vector<8x128xf32>
    %98 = arith.mulf %94, %96 : vector<8x128xf32>
    %99 = arith.mulf %95, %97 : vector<8x128xf32>
    %100 = arith.addf %98, %99 : vector<8x128xf32>
    %101 = arith.mulf %95, %96 : vector<8x128xf32>
    %102 = arith.mulf %94, %97 : vector<8x128xf32>
    %103 = arith.subf %101, %102 : vector<8x128xf32>
    %c4 = arith.constant 4 : index
    %104 = memref.load %arg1[%c4] : memref<36xf32, #tpu.memory_space<smem>>
    %c4_18 = arith.constant 4 : index
    %105 = memref.load %arg2[%c4_18] : memref<36xf32, #tpu.memory_space<smem>>
    %106 = vector.broadcast %104 : f32 to vector<8x128xf32>
    %107 = arith.mulf %106, %100 : vector<8x128xf32>
    %108 = vector.broadcast %105 : f32 to vector<8x128xf32>
    %109 = arith.mulf %108, %103 : vector<8x128xf32>
    %110 = arith.subf %107, %109 : vector<8x128xf32>
    %111 = vector.broadcast %104 : f32 to vector<8x128xf32>
    %112 = arith.mulf %111, %103 : vector<8x128xf32>
    %113 = vector.broadcast %105 : f32 to vector<8x128xf32>
    %114 = arith.mulf %113, %100 : vector<8x128xf32>
    %115 = arith.addf %112, %114 : vector<8x128xf32>
    %116 = arith.addf %92, %110 : vector<8x128xf32>
    %117 = arith.addf %93, %115 : vector<8x128xf32>
    %c2_i32 = arith.constant 2 : i32
    %118 = tpu.dynamic_rotate %0 by %c2_i32 dim 1 : vector<8x128xf32>, i32 -> vector<8x128xf32>
    %c2_i32_19 = arith.constant 2 : i32
    %119 = tpu.dynamic_rotate %1 by %c2_i32_19 dim 1 : vector<8x128xf32>, i32 -> vector<8x128xf32>
    %c127_i32_20 = arith.constant 127 : i32
    %120 = tpu.dynamic_rotate %0 by %c127_i32_20 dim 1 : vector<8x128xf32>, i32 -> vector<8x128xf32>
    %c127_i32_21 = arith.constant 127 : i32
    %121 = tpu.dynamic_rotate %1 by %c127_i32_21 dim 1 : vector<8x128xf32>, i32 -> vector<8x128xf32>
    %122 = arith.mulf %118, %120 : vector<8x128xf32>
    %123 = arith.mulf %119, %121 : vector<8x128xf32>
    %124 = arith.addf %122, %123 : vector<8x128xf32>
    %125 = arith.mulf %119, %120 : vector<8x128xf32>
    %126 = arith.mulf %118, %121 : vector<8x128xf32>
    %127 = arith.subf %125, %126 : vector<8x128xf32>
    %c5 = arith.constant 5 : index
    %128 = memref.load %arg1[%c5] : memref<36xf32, #tpu.memory_space<smem>>
    %c5_22 = arith.constant 5 : index
    %129 = memref.load %arg2[%c5_22] : memref<36xf32, #tpu.memory_space<smem>>
    %130 = vector.broadcast %128 : f32 to vector<8x128xf32>
    %131 = arith.mulf %130, %124 : vector<8x128xf32>
    %132 = vector.broadcast %129 : f32 to vector<8x128xf32>
    %133 = arith.mulf %132, %127 : vector<8x128xf32>
    %134 = arith.subf %131, %133 : vector<8x128xf32>
    %135 = vector.broadcast %128 : f32 to vector<8x128xf32>
    %136 = arith.mulf %135, %127 : vector<8x128xf32>
    %137 = vector.broadcast %129 : f32 to vector<8x128xf32>
    %138 = arith.mulf %137, %124 : vector<8x128xf32>
    %139 = arith.addf %136, %138 : vector<8x128xf32>
    %140 = arith.addf %116, %134 : vector<8x128xf32>
    %141 = arith.addf %117, %139 : vector<8x128xf32>
    %c4_i32 = arith.constant 4 : i32
    %142 = tpu.dynamic_rotate %140 by %c4_i32 dim 0 : vector<8x128xf32>, i32 -> vector<8x128xf32>
    %143 = arith.addf %140, %142 : vector<8x128xf32>
    %c4_i32_23 = arith.constant 4 : i32
    %144 = tpu.dynamic_rotate %141 by %c4_i32_23 dim 0 : vector<8x128xf32>, i32 -> vector<8x128xf32>
    %145 = arith.addf %141, %144 : vector<8x128xf32>
    %c125_i32_24 = arith.constant 125 : i32
    %146 = tpu.dynamic_rotate %0 by %c125_i32_24 dim 1 : vector<8x128xf32>, i32 -> vector<8x128xf32>
    %c125_i32_25 = arith.constant 125 : i32
    %147 = tpu.dynamic_rotate %1 by %c125_i32_25 dim 1 : vector<8x128xf32>, i32 -> vector<8x128xf32>
    %148 = arith.mulf %143, %146 : vector<8x128xf32>
    %149 = arith.mulf %145, %147 : vector<8x128xf32>
    %150 = arith.subf %148, %149 : vector<8x128xf32>
    %151 = arith.mulf %143, %147 : vector<8x128xf32>
    %152 = arith.mulf %145, %146 : vector<8x128xf32>
    %153 = arith.addf %151, %152 : vector<8x128xf32>
    %c125_i32_26 = arith.constant 125 : i32
    %154 = tpu.dynamic_rotate %0 by %c125_i32_26 dim 1 : vector<8x128xf32>, i32 -> vector<8x128xf32>
    %c125_i32_27 = arith.constant 125 : i32
    %155 = tpu.dynamic_rotate %1 by %c125_i32_27 dim 1 : vector<8x128xf32>, i32 -> vector<8x128xf32>
    %c123_i32_28 = arith.constant 123 : i32
    %156 = tpu.dynamic_rotate %0 by %c123_i32_28 dim 1 : vector<8x128xf32>, i32 -> vector<8x128xf32>
    %c123_i32_29 = arith.constant 123 : i32
    %157 = tpu.dynamic_rotate %1 by %c123_i32_29 dim 1 : vector<8x128xf32>, i32 -> vector<8x128xf32>
    %158 = arith.mulf %154, %156 : vector<8x128xf32>
    %159 = arith.mulf %155, %157 : vector<8x128xf32>
    %160 = arith.addf %158, %159 : vector<8x128xf32>
    %161 = arith.mulf %155, %156 : vector<8x128xf32>
    %162 = arith.mulf %154, %157 : vector<8x128xf32>
    %163 = arith.subf %161, %162 : vector<8x128xf32>
    %c6 = arith.constant 6 : index
    %164 = memref.load %arg1[%c6] : memref<36xf32, #tpu.memory_space<smem>>
    %c6_30 = arith.constant 6 : index
    %165 = memref.load %arg2[%c6_30] : memref<36xf32, #tpu.memory_space<smem>>
    %166 = vector.broadcast %164 : f32 to vector<8x128xf32>
    %167 = arith.mulf %166, %160 : vector<8x128xf32>
    %168 = vector.broadcast %165 : f32 to vector<8x128xf32>
    %169 = arith.mulf %168, %163 : vector<8x128xf32>
    %170 = arith.subf %167, %169 : vector<8x128xf32>
    %171 = vector.broadcast %164 : f32 to vector<8x128xf32>
    %172 = arith.mulf %171, %163 : vector<8x128xf32>
    %173 = vector.broadcast %165 : f32 to vector<8x128xf32>
    %174 = arith.mulf %173, %160 : vector<8x128xf32>
    %175 = arith.addf %172, %174 : vector<8x128xf32>
    %c126_i32_31 = arith.constant 126 : i32
    %176 = tpu.dynamic_rotate %0 by %c126_i32_31 dim 1 : vector<8x128xf32>, i32 -> vector<8x128xf32>
    %c126_i32_32 = arith.constant 126 : i32
    %177 = tpu.dynamic_rotate %1 by %c126_i32_32 dim 1 : vector<8x128xf32>, i32 -> vector<8x128xf32>
    %c124_i32_33 = arith.constant 124 : i32
    %178 = tpu.dynamic_rotate %0 by %c124_i32_33 dim 1 : vector<8x128xf32>, i32 -> vector<8x128xf32>
    %c124_i32_34 = arith.constant 124 : i32
    %179 = tpu.dynamic_rotate %1 by %c124_i32_34 dim 1 : vector<8x128xf32>, i32 -> vector<8x128xf32>
    %180 = arith.mulf %176, %178 : vector<8x128xf32>
    %181 = arith.mulf %177, %179 : vector<8x128xf32>
    %182 = arith.addf %180, %181 : vector<8x128xf32>
    %183 = arith.mulf %177, %178 : vector<8x128xf32>
    %184 = arith.mulf %176, %179 : vector<8x128xf32>
    %185 = arith.subf %183, %184 : vector<8x128xf32>
    %c7 = arith.constant 7 : index
    %186 = memref.load %arg1[%c7] : memref<36xf32, #tpu.memory_space<smem>>
    %c7_35 = arith.constant 7 : index
    %187 = memref.load %arg2[%c7_35] : memref<36xf32, #tpu.memory_space<smem>>
    %188 = vector.broadcast %186 : f32 to vector<8x128xf32>
    %189 = arith.mulf %188, %182 : vector<8x128xf32>
    %190 = vector.broadcast %187 : f32 to vector<8x128xf32>
    %191 = arith.mulf %190, %185 : vector<8x128xf32>
    %192 = arith.subf %189, %191 : vector<8x128xf32>
    %193 = vector.broadcast %186 : f32 to vector<8x128xf32>
    %194 = arith.mulf %193, %185 : vector<8x128xf32>
    %195 = vector.broadcast %187 : f32 to vector<8x128xf32>
    %196 = arith.mulf %195, %182 : vector<8x128xf32>
    %197 = arith.addf %194, %196 : vector<8x128xf32>
    %198 = arith.addf %170, %192 : vector<8x128xf32>
    %199 = arith.addf %175, %197 : vector<8x128xf32>
    %c127_i32_36 = arith.constant 127 : i32
    %200 = tpu.dynamic_rotate %0 by %c127_i32_36 dim 1 : vector<8x128xf32>, i32 -> vector<8x128xf32>
    %c127_i32_37 = arith.constant 127 : i32
    %201 = tpu.dynamic_rotate %1 by %c127_i32_37 dim 1 : vector<8x128xf32>, i32 -> vector<8x128xf32>
    %c125_i32_38 = arith.constant 125 : i32
    %202 = tpu.dynamic_rotate %0 by %c125_i32_38 dim 1 : vector<8x128xf32>, i32 -> vector<8x128xf32>
    %c125_i32_39 = arith.constant 125 : i32
    %203 = tpu.dynamic_rotate %1 by %c125_i32_39 dim 1 : vector<8x128xf32>, i32 -> vector<8x128xf32>
    %204 = arith.mulf %200, %202 : vector<8x128xf32>
    %205 = arith.mulf %201, %203 : vector<8x128xf32>
    %206 = arith.addf %204, %205 : vector<8x128xf32>
    %207 = arith.mulf %201, %202 : vector<8x128xf32>
    %208 = arith.mulf %200, %203 : vector<8x128xf32>
    %209 = arith.subf %207, %208 : vector<8x128xf32>
    %c8_40 = arith.constant 8 : index
    %210 = memref.load %arg1[%c8_40] : memref<36xf32, #tpu.memory_space<smem>>
    %c8_41 = arith.constant 8 : index
    %211 = memref.load %arg2[%c8_41] : memref<36xf32, #tpu.memory_space<smem>>
    %212 = vector.broadcast %210 : f32 to vector<8x128xf32>
    %213 = arith.mulf %212, %206 : vector<8x128xf32>
    %214 = vector.broadcast %211 : f32 to vector<8x128xf32>
    %215 = arith.mulf %214, %209 : vector<8x128xf32>
    %216 = arith.subf %213, %215 : vector<8x128xf32>
    %217 = vector.broadcast %210 : f32 to vector<8x128xf32>
    %218 = arith.mulf %217, %209 : vector<8x128xf32>
    %219 = vector.broadcast %211 : f32 to vector<8x128xf32>
    %220 = arith.mulf %219, %206 : vector<8x128xf32>
    %221 = arith.addf %218, %220 : vector<8x128xf32>
    %222 = arith.addf %198, %216 : vector<8x128xf32>
    %223 = arith.addf %199, %221 : vector<8x128xf32>
    %c126_i32_42 = arith.constant 126 : i32
    %224 = tpu.dynamic_rotate %0 by %c126_i32_42 dim 1 : vector<8x128xf32>, i32 -> vector<8x128xf32>
    %c126_i32_43 = arith.constant 126 : i32
    %225 = tpu.dynamic_rotate %1 by %c126_i32_43 dim 1 : vector<8x128xf32>, i32 -> vector<8x128xf32>
    %226 = arith.mulf %0, %224 : vector<8x128xf32>
    %227 = arith.mulf %1, %225 : vector<8x128xf32>
    %228 = arith.addf %226, %227 : vector<8x128xf32>
    %229 = arith.mulf %1, %224 : vector<8x128xf32>
    %230 = arith.mulf %0, %225 : vector<8x128xf32>
    %231 = arith.subf %229, %230 : vector<8x128xf32>
    %c9 = arith.constant 9 : index
    %232 = memref.load %arg1[%c9] : memref<36xf32, #tpu.memory_space<smem>>
    %c9_44 = arith.constant 9 : index
    %233 = memref.load %arg2[%c9_44] : memref<36xf32, #tpu.memory_space<smem>>
    %234 = vector.broadcast %232 : f32 to vector<8x128xf32>
    %235 = arith.mulf %234, %228 : vector<8x128xf32>
    %236 = vector.broadcast %233 : f32 to vector<8x128xf32>
    %237 = arith.mulf %236, %231 : vector<8x128xf32>
    %238 = arith.subf %235, %237 : vector<8x128xf32>
    %239 = vector.broadcast %232 : f32 to vector<8x128xf32>
    %240 = arith.mulf %239, %231 : vector<8x128xf32>
    %241 = vector.broadcast %233 : f32 to vector<8x128xf32>
    %242 = arith.mulf %241, %228 : vector<8x128xf32>
    %243 = arith.addf %240, %242 : vector<8x128xf32>
    %244 = arith.addf %222, %238 : vector<8x128xf32>
    %245 = arith.addf %223, %243 : vector<8x128xf32>
    %c1_i32_45 = arith.constant 1 : i32
    %246 = tpu.dynamic_rotate %0 by %c1_i32_45 dim 1 : vector<8x128xf32>, i32 -> vector<8x128xf32>
    %c1_i32_46 = arith.constant 1 : i32
    %247 = tpu.dynamic_rotate %1 by %c1_i32_46 dim 1 : vector<8x128xf32>, i32 -> vector<8x128xf32>
    %c127_i32_47 = arith.constant 127 : i32
    %248 = tpu.dynamic_rotate %0 by %c127_i32_47 dim 1 : vector<8x128xf32>, i32 -> vector<8x128xf32>
    %c127_i32_48 = arith.constant 127 : i32
    %249 = tpu.dynamic_rotate %1 by %c127_i32_48 dim 1 : vector<8x128xf32>, i32 -> vector<8x128xf32>
    %250 = arith.mulf %246, %248 : vector<8x128xf32>
    %251 = arith.mulf %247, %249 : vector<8x128xf32>
    %252 = arith.addf %250, %251 : vector<8x128xf32>
    %253 = arith.mulf %247, %248 : vector<8x128xf32>
    %254 = arith.mulf %246, %249 : vector<8x128xf32>
    %255 = arith.subf %253, %254 : vector<8x128xf32>
    %c10 = arith.constant 10 : index
    %256 = memref.load %arg1[%c10] : memref<36xf32, #tpu.memory_space<smem>>
    %c10_49 = arith.constant 10 : index
    %257 = memref.load %arg2[%c10_49] : memref<36xf32, #tpu.memory_space<smem>>
    %258 = vector.broadcast %256 : f32 to vector<8x128xf32>
    %259 = arith.mulf %258, %252 : vector<8x128xf32>
    %260 = vector.broadcast %257 : f32 to vector<8x128xf32>
    %261 = arith.mulf %260, %255 : vector<8x128xf32>
    %262 = arith.subf %259, %261 : vector<8x128xf32>
    %263 = vector.broadcast %256 : f32 to vector<8x128xf32>
    %264 = arith.mulf %263, %255 : vector<8x128xf32>
    %265 = vector.broadcast %257 : f32 to vector<8x128xf32>
    %266 = arith.mulf %265, %252 : vector<8x128xf32>
    %267 = arith.addf %264, %266 : vector<8x128xf32>
    %268 = arith.addf %244, %262 : vector<8x128xf32>
    %269 = arith.addf %245, %267 : vector<8x128xf32>
    %c2_i32_50 = arith.constant 2 : i32
    %270 = tpu.dynamic_rotate %0 by %c2_i32_50 dim 1 : vector<8x128xf32>, i32 -> vector<8x128xf32>
    %c2_i32_51 = arith.constant 2 : i32
    %271 = tpu.dynamic_rotate %1 by %c2_i32_51 dim 1 : vector<8x128xf32>, i32 -> vector<8x128xf32>
    %272 = arith.mulf %270, %0 : vector<8x128xf32>
    %273 = arith.mulf %271, %1 : vector<8x128xf32>
    %274 = arith.addf %272, %273 : vector<8x128xf32>
    %275 = arith.mulf %271, %0 : vector<8x128xf32>
    %276 = arith.mulf %270, %1 : vector<8x128xf32>
    %277 = arith.subf %275, %276 : vector<8x128xf32>
    %c11 = arith.constant 11 : index
    %278 = memref.load %arg1[%c11] : memref<36xf32, #tpu.memory_space<smem>>
    %c11_52 = arith.constant 11 : index
    %279 = memref.load %arg2[%c11_52] : memref<36xf32, #tpu.memory_space<smem>>
    %280 = vector.broadcast %278 : f32 to vector<8x128xf32>
    %281 = arith.mulf %280, %274 : vector<8x128xf32>
    %282 = vector.broadcast %279 : f32 to vector<8x128xf32>
    %283 = arith.mulf %282, %277 : vector<8x128xf32>
    %284 = arith.subf %281, %283 : vector<8x128xf32>
    %285 = vector.broadcast %278 : f32 to vector<8x128xf32>
    %286 = arith.mulf %285, %277 : vector<8x128xf32>
    %287 = vector.broadcast %279 : f32 to vector<8x128xf32>
    %288 = arith.mulf %287, %274 : vector<8x128xf32>
    %289 = arith.addf %286, %288 : vector<8x128xf32>
    %290 = arith.addf %268, %284 : vector<8x128xf32>
    %291 = arith.addf %269, %289 : vector<8x128xf32>
    %c4_i32_53 = arith.constant 4 : i32
    %292 = tpu.dynamic_rotate %290 by %c4_i32_53 dim 0 : vector<8x128xf32>, i32 -> vector<8x128xf32>
    %293 = arith.addf %290, %292 : vector<8x128xf32>
    %c4_i32_54 = arith.constant 4 : i32
    %294 = tpu.dynamic_rotate %291 by %c4_i32_54 dim 0 : vector<8x128xf32>, i32 -> vector<8x128xf32>
    %295 = arith.addf %291, %294 : vector<8x128xf32>
    %c126_i32_55 = arith.constant 126 : i32
    %296 = tpu.dynamic_rotate %0 by %c126_i32_55 dim 1 : vector<8x128xf32>, i32 -> vector<8x128xf32>
    %c126_i32_56 = arith.constant 126 : i32
    %297 = tpu.dynamic_rotate %1 by %c126_i32_56 dim 1 : vector<8x128xf32>, i32 -> vector<8x128xf32>
    %298 = arith.mulf %293, %296 : vector<8x128xf32>
    %299 = arith.mulf %295, %297 : vector<8x128xf32>
    %300 = arith.subf %298, %299 : vector<8x128xf32>
    %301 = arith.mulf %293, %297 : vector<8x128xf32>
    %302 = arith.mulf %295, %296 : vector<8x128xf32>
    %303 = arith.addf %301, %302 : vector<8x128xf32>
    %304 = arith.addf %150, %300 : vector<8x128xf32>
    %305 = arith.addf %153, %303 : vector<8x128xf32>
    %c125_i32_57 = arith.constant 125 : i32
    %306 = tpu.dynamic_rotate %0 by %c125_i32_57 dim 1 : vector<8x128xf32>, i32 -> vector<8x128xf32>
    %c125_i32_58 = arith.constant 125 : i32
    %307 = tpu.dynamic_rotate %1 by %c125_i32_58 dim 1 : vector<8x128xf32>, i32 -> vector<8x128xf32>
    %c124_i32_59 = arith.constant 124 : i32
    %308 = tpu.dynamic_rotate %0 by %c124_i32_59 dim 1 : vector<8x128xf32>, i32 -> vector<8x128xf32>
    %c124_i32_60 = arith.constant 124 : i32
    %309 = tpu.dynamic_rotate %1 by %c124_i32_60 dim 1 : vector<8x128xf32>, i32 -> vector<8x128xf32>
    %310 = arith.mulf %306, %308 : vector<8x128xf32>
    %311 = arith.mulf %307, %309 : vector<8x128xf32>
    %312 = arith.addf %310, %311 : vector<8x128xf32>
    %313 = arith.mulf %307, %308 : vector<8x128xf32>
    %314 = arith.mulf %306, %309 : vector<8x128xf32>
    %315 = arith.subf %313, %314 : vector<8x128xf32>
    %c12 = arith.constant 12 : index
    %316 = memref.load %arg1[%c12] : memref<36xf32, #tpu.memory_space<smem>>
    %c12_61 = arith.constant 12 : index
    %317 = memref.load %arg2[%c12_61] : memref<36xf32, #tpu.memory_space<smem>>
    %318 = vector.broadcast %316 : f32 to vector<8x128xf32>
    %319 = arith.mulf %318, %312 : vector<8x128xf32>
    %320 = vector.broadcast %317 : f32 to vector<8x128xf32>
    %321 = arith.mulf %320, %315 : vector<8x128xf32>
    %322 = arith.subf %319, %321 : vector<8x128xf32>
    %323 = vector.broadcast %316 : f32 to vector<8x128xf32>
    %324 = arith.mulf %323, %315 : vector<8x128xf32>
    %325 = vector.broadcast %317 : f32 to vector<8x128xf32>
    %326 = arith.mulf %325, %312 : vector<8x128xf32>
    %327 = arith.addf %324, %326 : vector<8x128xf32>
    %c126_i32_62 = arith.constant 126 : i32
    %328 = tpu.dynamic_rotate %0 by %c126_i32_62 dim 1 : vector<8x128xf32>, i32 -> vector<8x128xf32>
    %c126_i32_63 = arith.constant 126 : i32
    %329 = tpu.dynamic_rotate %1 by %c126_i32_63 dim 1 : vector<8x128xf32>, i32 -> vector<8x128xf32>
    %c125_i32_64 = arith.constant 125 : i32
    %330 = tpu.dynamic_rotate %0 by %c125_i32_64 dim 1 : vector<8x128xf32>, i32 -> vector<8x128xf32>
    %c125_i32_65 = arith.constant 125 : i32
    %331 = tpu.dynamic_rotate %1 by %c125_i32_65 dim 1 : vector<8x128xf32>, i32 -> vector<8x128xf32>
    %332 = arith.mulf %328, %330 : vector<8x128xf32>
    %333 = arith.mulf %329, %331 : vector<8x128xf32>
    %334 = arith.addf %332, %333 : vector<8x128xf32>
    %335 = arith.mulf %329, %330 : vector<8x128xf32>
    %336 = arith.mulf %328, %331 : vector<8x128xf32>
    %337 = arith.subf %335, %336 : vector<8x128xf32>
    %c13 = arith.constant 13 : index
    %338 = memref.load %arg1[%c13] : memref<36xf32, #tpu.memory_space<smem>>
    %c13_66 = arith.constant 13 : index
    %339 = memref.load %arg2[%c13_66] : memref<36xf32, #tpu.memory_space<smem>>
    %340 = vector.broadcast %338 : f32 to vector<8x128xf32>
    %341 = arith.mulf %340, %334 : vector<8x128xf32>
    %342 = vector.broadcast %339 : f32 to vector<8x128xf32>
    %343 = arith.mulf %342, %337 : vector<8x128xf32>
    %344 = arith.subf %341, %343 : vector<8x128xf32>
    %345 = vector.broadcast %338 : f32 to vector<8x128xf32>
    %346 = arith.mulf %345, %337 : vector<8x128xf32>
    %347 = vector.broadcast %339 : f32 to vector<8x128xf32>
    %348 = arith.mulf %347, %334 : vector<8x128xf32>
    %349 = arith.addf %346, %348 : vector<8x128xf32>
    %350 = arith.addf %322, %344 : vector<8x128xf32>
    %351 = arith.addf %327, %349 : vector<8x128xf32>
    %c127_i32_67 = arith.constant 127 : i32
    %352 = tpu.dynamic_rotate %0 by %c127_i32_67 dim 1 : vector<8x128xf32>, i32 -> vector<8x128xf32>
    %c127_i32_68 = arith.constant 127 : i32
    %353 = tpu.dynamic_rotate %1 by %c127_i32_68 dim 1 : vector<8x128xf32>, i32 -> vector<8x128xf32>
    %c126_i32_69 = arith.constant 126 : i32
    %354 = tpu.dynamic_rotate %0 by %c126_i32_69 dim 1 : vector<8x128xf32>, i32 -> vector<8x128xf32>
    %c126_i32_70 = arith.constant 126 : i32
    %355 = tpu.dynamic_rotate %1 by %c126_i32_70 dim 1 : vector<8x128xf32>, i32 -> vector<8x128xf32>
    %356 = arith.mulf %352, %354 : vector<8x128xf32>
    %357 = arith.mulf %353, %355 : vector<8x128xf32>
    %358 = arith.addf %356, %357 : vector<8x128xf32>
    %359 = arith.mulf %353, %354 : vector<8x128xf32>
    %360 = arith.mulf %352, %355 : vector<8x128xf32>
    %361 = arith.subf %359, %360 : vector<8x128xf32>
    %c14 = arith.constant 14 : index
    %362 = memref.load %arg1[%c14] : memref<36xf32, #tpu.memory_space<smem>>
    %c14_71 = arith.constant 14 : index
    %363 = memref.load %arg2[%c14_71] : memref<36xf32, #tpu.memory_space<smem>>
    %364 = vector.broadcast %362 : f32 to vector<8x128xf32>
    %365 = arith.mulf %364, %358 : vector<8x128xf32>
    %366 = vector.broadcast %363 : f32 to vector<8x128xf32>
    %367 = arith.mulf %366, %361 : vector<8x128xf32>
    %368 = arith.subf %365, %367 : vector<8x128xf32>
    %369 = vector.broadcast %362 : f32 to vector<8x128xf32>
    %370 = arith.mulf %369, %361 : vector<8x128xf32>
    %371 = vector.broadcast %363 : f32 to vector<8x128xf32>
    %372 = arith.mulf %371, %358 : vector<8x128xf32>
    %373 = arith.addf %370, %372 : vector<8x128xf32>
    %374 = arith.addf %350, %368 : vector<8x128xf32>
    %375 = arith.addf %351, %373 : vector<8x128xf32>
    %c127_i32_72 = arith.constant 127 : i32
    %376 = tpu.dynamic_rotate %0 by %c127_i32_72 dim 1 : vector<8x128xf32>, i32 -> vector<8x128xf32>
    %c127_i32_73 = arith.constant 127 : i32
    %377 = tpu.dynamic_rotate %1 by %c127_i32_73 dim 1 : vector<8x128xf32>, i32 -> vector<8x128xf32>
    %378 = arith.mulf %0, %376 : vector<8x128xf32>
    %379 = arith.mulf %1, %377 : vector<8x128xf32>
    %380 = arith.addf %378, %379 : vector<8x128xf32>
    %381 = arith.mulf %1, %376 : vector<8x128xf32>
    %382 = arith.mulf %0, %377 : vector<8x128xf32>
    %383 = arith.subf %381, %382 : vector<8x128xf32>
    %c15 = arith.constant 15 : index
    %384 = memref.load %arg1[%c15] : memref<36xf32, #tpu.memory_space<smem>>
    %c15_74 = arith.constant 15 : index
    %385 = memref.load %arg2[%c15_74] : memref<36xf32, #tpu.memory_space<smem>>
    %386 = vector.broadcast %384 : f32 to vector<8x128xf32>
    %387 = arith.mulf %386, %380 : vector<8x128xf32>
    %388 = vector.broadcast %385 : f32 to vector<8x128xf32>
    %389 = arith.mulf %388, %383 : vector<8x128xf32>
    %390 = arith.subf %387, %389 : vector<8x128xf32>
    %391 = vector.broadcast %384 : f32 to vector<8x128xf32>
    %392 = arith.mulf %391, %383 : vector<8x128xf32>
    %393 = vector.broadcast %385 : f32 to vector<8x128xf32>
    %394 = arith.mulf %393, %380 : vector<8x128xf32>
    %395 = arith.addf %392, %394 : vector<8x128xf32>
    %396 = arith.addf %374, %390 : vector<8x128xf32>
    %397 = arith.addf %375, %395 : vector<8x128xf32>
    %c1_i32_75 = arith.constant 1 : i32
    %398 = tpu.dynamic_rotate %0 by %c1_i32_75 dim 1 : vector<8x128xf32>, i32 -> vector<8x128xf32>
    %c1_i32_76 = arith.constant 1 : i32
    %399 = tpu.dynamic_rotate %1 by %c1_i32_76 dim 1 : vector<8x128xf32>, i32 -> vector<8x128xf32>
    %400 = arith.mulf %398, %0 : vector<8x128xf32>
    %401 = arith.mulf %399, %1 : vector<8x128xf32>
    %402 = arith.addf %400, %401 : vector<8x128xf32>
    %403 = arith.mulf %399, %0 : vector<8x128xf32>
    %404 = arith.mulf %398, %1 : vector<8x128xf32>
    %405 = arith.subf %403, %404 : vector<8x128xf32>
    %c16 = arith.constant 16 : index
    %406 = memref.load %arg1[%c16] : memref<36xf32, #tpu.memory_space<smem>>
    %c16_77 = arith.constant 16 : index
    %407 = memref.load %arg2[%c16_77] : memref<36xf32, #tpu.memory_space<smem>>
    %408 = vector.broadcast %406 : f32 to vector<8x128xf32>
    %409 = arith.mulf %408, %402 : vector<8x128xf32>
    %410 = vector.broadcast %407 : f32 to vector<8x128xf32>
    %411 = arith.mulf %410, %405 : vector<8x128xf32>
    %412 = arith.subf %409, %411 : vector<8x128xf32>
    %413 = vector.broadcast %406 : f32 to vector<8x128xf32>
    %414 = arith.mulf %413, %405 : vector<8x128xf32>
    %415 = vector.broadcast %407 : f32 to vector<8x128xf32>
    %416 = arith.mulf %415, %402 : vector<8x128xf32>
    %417 = arith.addf %414, %416 : vector<8x128xf32>
    %418 = arith.addf %396, %412 : vector<8x128xf32>
    %419 = arith.addf %397, %417 : vector<8x128xf32>
    %c2_i32_78 = arith.constant 2 : i32
    %420 = tpu.dynamic_rotate %0 by %c2_i32_78 dim 1 : vector<8x128xf32>, i32 -> vector<8x128xf32>
    %c2_i32_79 = arith.constant 2 : i32
    %421 = tpu.dynamic_rotate %1 by %c2_i32_79 dim 1 : vector<8x128xf32>, i32 -> vector<8x128xf32>
    %c1_i32_80 = arith.constant 1 : i32
    %422 = tpu.dynamic_rotate %0 by %c1_i32_80 dim 1 : vector<8x128xf32>, i32 -> vector<8x128xf32>
    %c1_i32_81 = arith.constant 1 : i32
    %423 = tpu.dynamic_rotate %1 by %c1_i32_81 dim 1 : vector<8x128xf32>, i32 -> vector<8x128xf32>
    %424 = arith.mulf %420, %422 : vector<8x128xf32>
    %425 = arith.mulf %421, %423 : vector<8x128xf32>
    %426 = arith.addf %424, %425 : vector<8x128xf32>
    %427 = arith.mulf %421, %422 : vector<8x128xf32>
    %428 = arith.mulf %420, %423 : vector<8x128xf32>
    %429 = arith.subf %427, %428 : vector<8x128xf32>
    %c17 = arith.constant 17 : index
    %430 = memref.load %arg1[%c17] : memref<36xf32, #tpu.memory_space<smem>>
    %c17_82 = arith.constant 17 : index
    %431 = memref.load %arg2[%c17_82] : memref<36xf32, #tpu.memory_space<smem>>
    %432 = vector.broadcast %430 : f32 to vector<8x128xf32>
    %433 = arith.mulf %432, %426 : vector<8x128xf32>
    %434 = vector.broadcast %431 : f32 to vector<8x128xf32>
    %435 = arith.mulf %434, %429 : vector<8x128xf32>
    %436 = arith.subf %433, %435 : vector<8x128xf32>
    %437 = vector.broadcast %430 : f32 to vector<8x128xf32>
    %438 = arith.mulf %437, %429 : vector<8x128xf32>
    %439 = vector.broadcast %431 : f32 to vector<8x128xf32>
    %440 = arith.mulf %439, %426 : vector<8x128xf32>
    %441 = arith.addf %438, %440 : vector<8x128xf32>
    %442 = arith.addf %418, %436 : vector<8x128xf32>
    %443 = arith.addf %419, %441 : vector<8x128xf32>
    %c4_i32_83 = arith.constant 4 : i32
    %444 = tpu.dynamic_rotate %442 by %c4_i32_83 dim 0 : vector<8x128xf32>, i32 -> vector<8x128xf32>
    %445 = arith.addf %442, %444 : vector<8x128xf32>
    %c4_i32_84 = arith.constant 4 : i32
    %446 = tpu.dynamic_rotate %443 by %c4_i32_84 dim 0 : vector<8x128xf32>, i32 -> vector<8x128xf32>
    %447 = arith.addf %443, %446 : vector<8x128xf32>
    %c127_i32_85 = arith.constant 127 : i32
    %448 = tpu.dynamic_rotate %0 by %c127_i32_85 dim 1 : vector<8x128xf32>, i32 -> vector<8x128xf32>
    %c127_i32_86 = arith.constant 127 : i32
    %449 = tpu.dynamic_rotate %1 by %c127_i32_86 dim 1 : vector<8x128xf32>, i32 -> vector<8x128xf32>
    %450 = arith.mulf %445, %448 : vector<8x128xf32>
    %451 = arith.mulf %447, %449 : vector<8x128xf32>
    %452 = arith.subf %450, %451 : vector<8x128xf32>
    %453 = arith.mulf %445, %449 : vector<8x128xf32>
    %454 = arith.mulf %447, %448 : vector<8x128xf32>
    %455 = arith.addf %453, %454 : vector<8x128xf32>
    %456 = arith.addf %304, %452 : vector<8x128xf32>
    %457 = arith.addf %305, %455 : vector<8x128xf32>
    %c125_i32_87 = arith.constant 125 : i32
    %458 = tpu.dynamic_rotate %0 by %c125_i32_87 dim 1 : vector<8x128xf32>, i32 -> vector<8x128xf32>
    %c125_i32_88 = arith.constant 125 : i32
    %459 = tpu.dynamic_rotate %1 by %c125_i32_88 dim 1 : vector<8x128xf32>, i32 -> vector<8x128xf32>
    %c125_i32_89 = arith.constant 125 : i32
    %460 = tpu.dynamic_rotate %0 by %c125_i32_89 dim 1 : vector<8x128xf32>, i32 -> vector<8x128xf32>
    %c125_i32_90 = arith.constant 125 : i32
    %461 = tpu.dynamic_rotate %1 by %c125_i32_90 dim 1 : vector<8x128xf32>, i32 -> vector<8x128xf32>
    %462 = arith.mulf %458, %460 : vector<8x128xf32>
    %463 = arith.mulf %459, %461 : vector<8x128xf32>
    %464 = arith.addf %462, %463 : vector<8x128xf32>
    %465 = arith.mulf %459, %460 : vector<8x128xf32>
    %466 = arith.mulf %458, %461 : vector<8x128xf32>
    %467 = arith.subf %465, %466 : vector<8x128xf32>
    %c18 = arith.constant 18 : index
    %468 = memref.load %arg1[%c18] : memref<36xf32, #tpu.memory_space<smem>>
    %c18_91 = arith.constant 18 : index
    %469 = memref.load %arg2[%c18_91] : memref<36xf32, #tpu.memory_space<smem>>
    %470 = vector.broadcast %468 : f32 to vector<8x128xf32>
    %471 = arith.mulf %470, %464 : vector<8x128xf32>
    %472 = vector.broadcast %469 : f32 to vector<8x128xf32>
    %473 = arith.mulf %472, %467 : vector<8x128xf32>
    %474 = arith.subf %471, %473 : vector<8x128xf32>
    %475 = vector.broadcast %468 : f32 to vector<8x128xf32>
    %476 = arith.mulf %475, %467 : vector<8x128xf32>
    %477 = vector.broadcast %469 : f32 to vector<8x128xf32>
    %478 = arith.mulf %477, %464 : vector<8x128xf32>
    %479 = arith.addf %476, %478 : vector<8x128xf32>
    %c126_i32_92 = arith.constant 126 : i32
    %480 = tpu.dynamic_rotate %0 by %c126_i32_92 dim 1 : vector<8x128xf32>, i32 -> vector<8x128xf32>
    %c126_i32_93 = arith.constant 126 : i32
    %481 = tpu.dynamic_rotate %1 by %c126_i32_93 dim 1 : vector<8x128xf32>, i32 -> vector<8x128xf32>
    %c126_i32_94 = arith.constant 126 : i32
    %482 = tpu.dynamic_rotate %0 by %c126_i32_94 dim 1 : vector<8x128xf32>, i32 -> vector<8x128xf32>
    %c126_i32_95 = arith.constant 126 : i32
    %483 = tpu.dynamic_rotate %1 by %c126_i32_95 dim 1 : vector<8x128xf32>, i32 -> vector<8x128xf32>
    %484 = arith.mulf %480, %482 : vector<8x128xf32>
    %485 = arith.mulf %481, %483 : vector<8x128xf32>
    %486 = arith.addf %484, %485 : vector<8x128xf32>
    %487 = arith.mulf %481, %482 : vector<8x128xf32>
    %488 = arith.mulf %480, %483 : vector<8x128xf32>
    %489 = arith.subf %487, %488 : vector<8x128xf32>
    %c19 = arith.constant 19 : index
    %490 = memref.load %arg1[%c19] : memref<36xf32, #tpu.memory_space<smem>>
    %c19_96 = arith.constant 19 : index
    %491 = memref.load %arg2[%c19_96] : memref<36xf32, #tpu.memory_space<smem>>
    %492 = vector.broadcast %490 : f32 to vector<8x128xf32>
    %493 = arith.mulf %492, %486 : vector<8x128xf32>
    %494 = vector.broadcast %491 : f32 to vector<8x128xf32>
    %495 = arith.mulf %494, %489 : vector<8x128xf32>
    %496 = arith.subf %493, %495 : vector<8x128xf32>
    %497 = vector.broadcast %490 : f32 to vector<8x128xf32>
    %498 = arith.mulf %497, %489 : vector<8x128xf32>
    %499 = vector.broadcast %491 : f32 to vector<8x128xf32>
    %500 = arith.mulf %499, %486 : vector<8x128xf32>
    %501 = arith.addf %498, %500 : vector<8x128xf32>
    %502 = arith.addf %474, %496 : vector<8x128xf32>
    %503 = arith.addf %479, %501 : vector<8x128xf32>
    %c127_i32_97 = arith.constant 127 : i32
    %504 = tpu.dynamic_rotate %0 by %c127_i32_97 dim 1 : vector<8x128xf32>, i32 -> vector<8x128xf32>
    %c127_i32_98 = arith.constant 127 : i32
    %505 = tpu.dynamic_rotate %1 by %c127_i32_98 dim 1 : vector<8x128xf32>, i32 -> vector<8x128xf32>
    %c127_i32_99 = arith.constant 127 : i32
    %506 = tpu.dynamic_rotate %0 by %c127_i32_99 dim 1 : vector<8x128xf32>, i32 -> vector<8x128xf32>
    %c127_i32_100 = arith.constant 127 : i32
    %507 = tpu.dynamic_rotate %1 by %c127_i32_100 dim 1 : vector<8x128xf32>, i32 -> vector<8x128xf32>
    %508 = arith.mulf %504, %506 : vector<8x128xf32>
    %509 = arith.mulf %505, %507 : vector<8x128xf32>
    %510 = arith.addf %508, %509 : vector<8x128xf32>
    %511 = arith.mulf %505, %506 : vector<8x128xf32>
    %512 = arith.mulf %504, %507 : vector<8x128xf32>
    %513 = arith.subf %511, %512 : vector<8x128xf32>
    %c20 = arith.constant 20 : index
    %514 = memref.load %arg1[%c20] : memref<36xf32, #tpu.memory_space<smem>>
    %c20_101 = arith.constant 20 : index
    %515 = memref.load %arg2[%c20_101] : memref<36xf32, #tpu.memory_space<smem>>
    %516 = vector.broadcast %514 : f32 to vector<8x128xf32>
    %517 = arith.mulf %516, %510 : vector<8x128xf32>
    %518 = vector.broadcast %515 : f32 to vector<8x128xf32>
    %519 = arith.mulf %518, %513 : vector<8x128xf32>
    %520 = arith.subf %517, %519 : vector<8x128xf32>
    %521 = vector.broadcast %514 : f32 to vector<8x128xf32>
    %522 = arith.mulf %521, %513 : vector<8x128xf32>
    %523 = vector.broadcast %515 : f32 to vector<8x128xf32>
    %524 = arith.mulf %523, %510 : vector<8x128xf32>
    %525 = arith.addf %522, %524 : vector<8x128xf32>
    %526 = arith.addf %502, %520 : vector<8x128xf32>
    %527 = arith.addf %503, %525 : vector<8x128xf32>
    %528 = arith.mulf %0, %0 : vector<8x128xf32>
    %529 = arith.mulf %1, %1 : vector<8x128xf32>
    %530 = arith.addf %528, %529 : vector<8x128xf32>
    %531 = arith.mulf %1, %0 : vector<8x128xf32>
    %532 = arith.mulf %0, %1 : vector<8x128xf32>
    %533 = arith.subf %531, %532 : vector<8x128xf32>
    %c21 = arith.constant 21 : index
    %534 = memref.load %arg1[%c21] : memref<36xf32, #tpu.memory_space<smem>>
    %c21_102 = arith.constant 21 : index
    %535 = memref.load %arg2[%c21_102] : memref<36xf32, #tpu.memory_space<smem>>
    %536 = vector.broadcast %534 : f32 to vector<8x128xf32>
    %537 = arith.mulf %536, %530 : vector<8x128xf32>
    %538 = vector.broadcast %535 : f32 to vector<8x128xf32>
    %539 = arith.mulf %538, %533 : vector<8x128xf32>
    %540 = arith.subf %537, %539 : vector<8x128xf32>
    %541 = vector.broadcast %534 : f32 to vector<8x128xf32>
    %542 = arith.mulf %541, %533 : vector<8x128xf32>
    %543 = vector.broadcast %535 : f32 to vector<8x128xf32>
    %544 = arith.mulf %543, %530 : vector<8x128xf32>
    %545 = arith.addf %542, %544 : vector<8x128xf32>
    %546 = arith.addf %526, %540 : vector<8x128xf32>
    %547 = arith.addf %527, %545 : vector<8x128xf32>
    %c1_i32_103 = arith.constant 1 : i32
    %548 = tpu.dynamic_rotate %0 by %c1_i32_103 dim 1 : vector<8x128xf32>, i32 -> vector<8x128xf32>
    %c1_i32_104 = arith.constant 1 : i32
    %549 = tpu.dynamic_rotate %1 by %c1_i32_104 dim 1 : vector<8x128xf32>, i32 -> vector<8x128xf32>
    %c1_i32_105 = arith.constant 1 : i32
    %550 = tpu.dynamic_rotate %0 by %c1_i32_105 dim 1 : vector<8x128xf32>, i32 -> vector<8x128xf32>
    %c1_i32_106 = arith.constant 1 : i32
    %551 = tpu.dynamic_rotate %1 by %c1_i32_106 dim 1 : vector<8x128xf32>, i32 -> vector<8x128xf32>
    %552 = arith.mulf %548, %550 : vector<8x128xf32>
    %553 = arith.mulf %549, %551 : vector<8x128xf32>
    %554 = arith.addf %552, %553 : vector<8x128xf32>
    %555 = arith.mulf %549, %550 : vector<8x128xf32>
    %556 = arith.mulf %548, %551 : vector<8x128xf32>
    %557 = arith.subf %555, %556 : vector<8x128xf32>
    %c22 = arith.constant 22 : index
    %558 = memref.load %arg1[%c22] : memref<36xf32, #tpu.memory_space<smem>>
    %c22_107 = arith.constant 22 : index
    %559 = memref.load %arg2[%c22_107] : memref<36xf32, #tpu.memory_space<smem>>
    %560 = vector.broadcast %558 : f32 to vector<8x128xf32>
    %561 = arith.mulf %560, %554 : vector<8x128xf32>
    %562 = vector.broadcast %559 : f32 to vector<8x128xf32>
    %563 = arith.mulf %562, %557 : vector<8x128xf32>
    %564 = arith.subf %561, %563 : vector<8x128xf32>
    %565 = vector.broadcast %558 : f32 to vector<8x128xf32>
    %566 = arith.mulf %565, %557 : vector<8x128xf32>
    %567 = vector.broadcast %559 : f32 to vector<8x128xf32>
    %568 = arith.mulf %567, %554 : vector<8x128xf32>
    %569 = arith.addf %566, %568 : vector<8x128xf32>
    %570 = arith.addf %546, %564 : vector<8x128xf32>
    %571 = arith.addf %547, %569 : vector<8x128xf32>
    %c2_i32_108 = arith.constant 2 : i32
    %572 = tpu.dynamic_rotate %0 by %c2_i32_108 dim 1 : vector<8x128xf32>, i32 -> vector<8x128xf32>
    %c2_i32_109 = arith.constant 2 : i32
    %573 = tpu.dynamic_rotate %1 by %c2_i32_109 dim 1 : vector<8x128xf32>, i32 -> vector<8x128xf32>
    %c2_i32_110 = arith.constant 2 : i32
    %574 = tpu.dynamic_rotate %0 by %c2_i32_110 dim 1 : vector<8x128xf32>, i32 -> vector<8x128xf32>
    %c2_i32_111 = arith.constant 2 : i32
    %575 = tpu.dynamic_rotate %1 by %c2_i32_111 dim 1 : vector<8x128xf32>, i32 -> vector<8x128xf32>
    %576 = arith.mulf %572, %574 : vector<8x128xf32>
    %577 = arith.mulf %573, %575 : vector<8x128xf32>
    %578 = arith.addf %576, %577 : vector<8x128xf32>
    %579 = arith.mulf %573, %574 : vector<8x128xf32>
    %580 = arith.mulf %572, %575 : vector<8x128xf32>
    %581 = arith.subf %579, %580 : vector<8x128xf32>
    %c23 = arith.constant 23 : index
    %582 = memref.load %arg1[%c23] : memref<36xf32, #tpu.memory_space<smem>>
    %c23_112 = arith.constant 23 : index
    %583 = memref.load %arg2[%c23_112] : memref<36xf32, #tpu.memory_space<smem>>
    %584 = vector.broadcast %582 : f32 to vector<8x128xf32>
    %585 = arith.mulf %584, %578 : vector<8x128xf32>
    %586 = vector.broadcast %583 : f32 to vector<8x128xf32>
    %587 = arith.mulf %586, %581 : vector<8x128xf32>
    %588 = arith.subf %585, %587 : vector<8x128xf32>
    %589 = vector.broadcast %582 : f32 to vector<8x128xf32>
    %590 = arith.mulf %589, %581 : vector<8x128xf32>
    %591 = vector.broadcast %583 : f32 to vector<8x128xf32>
    %592 = arith.mulf %591, %578 : vector<8x128xf32>
    %593 = arith.addf %590, %592 : vector<8x128xf32>
    %594 = arith.addf %570, %588 : vector<8x128xf32>
    %595 = arith.addf %571, %593 : vector<8x128xf32>
    %c4_i32_113 = arith.constant 4 : i32
    %596 = tpu.dynamic_rotate %594 by %c4_i32_113 dim 0 : vector<8x128xf32>, i32 -> vector<8x128xf32>
    %597 = arith.addf %594, %596 : vector<8x128xf32>
    %c4_i32_114 = arith.constant 4 : i32
    %598 = tpu.dynamic_rotate %595 by %c4_i32_114 dim 0 : vector<8x128xf32>, i32 -> vector<8x128xf32>
    %599 = arith.addf %595, %598 : vector<8x128xf32>
    %600 = arith.mulf %597, %0 : vector<8x128xf32>
    %601 = arith.mulf %599, %1 : vector<8x128xf32>
    %602 = arith.subf %600, %601 : vector<8x128xf32>
    %603 = arith.mulf %597, %1 : vector<8x128xf32>
    %604 = arith.mulf %599, %0 : vector<8x128xf32>
    %605 = arith.addf %603, %604 : vector<8x128xf32>
    %606 = arith.addf %456, %602 : vector<8x128xf32>
    %607 = arith.addf %457, %605 : vector<8x128xf32>
    %c125_i32_115 = arith.constant 125 : i32
    %608 = tpu.dynamic_rotate %0 by %c125_i32_115 dim 1 : vector<8x128xf32>, i32 -> vector<8x128xf32>
    %c125_i32_116 = arith.constant 125 : i32
    %609 = tpu.dynamic_rotate %1 by %c125_i32_116 dim 1 : vector<8x128xf32>, i32 -> vector<8x128xf32>
    %c126_i32_117 = arith.constant 126 : i32
    %610 = tpu.dynamic_rotate %0 by %c126_i32_117 dim 1 : vector<8x128xf32>, i32 -> vector<8x128xf32>
    %c126_i32_118 = arith.constant 126 : i32
    %611 = tpu.dynamic_rotate %1 by %c126_i32_118 dim 1 : vector<8x128xf32>, i32 -> vector<8x128xf32>
    %612 = arith.mulf %608, %610 : vector<8x128xf32>
    %613 = arith.mulf %609, %611 : vector<8x128xf32>
    %614 = arith.addf %612, %613 : vector<8x128xf32>
    %615 = arith.mulf %609, %610 : vector<8x128xf32>
    %616 = arith.mulf %608, %611 : vector<8x128xf32>
    %617 = arith.subf %615, %616 : vector<8x128xf32>
    %c24 = arith.constant 24 : index
    %618 = memref.load %arg1[%c24] : memref<36xf32, #tpu.memory_space<smem>>
    %c24_119 = arith.constant 24 : index
    %619 = memref.load %arg2[%c24_119] : memref<36xf32, #tpu.memory_space<smem>>
    %620 = vector.broadcast %618 : f32 to vector<8x128xf32>
    %621 = arith.mulf %620, %614 : vector<8x128xf32>
    %622 = vector.broadcast %619 : f32 to vector<8x128xf32>
    %623 = arith.mulf %622, %617 : vector<8x128xf32>
    %624 = arith.subf %621, %623 : vector<8x128xf32>
    %625 = vector.broadcast %618 : f32 to vector<8x128xf32>
    %626 = arith.mulf %625, %617 : vector<8x128xf32>
    %627 = vector.broadcast %619 : f32 to vector<8x128xf32>
    %628 = arith.mulf %627, %614 : vector<8x128xf32>
    %629 = arith.addf %626, %628 : vector<8x128xf32>
    %c126_i32_120 = arith.constant 126 : i32
    %630 = tpu.dynamic_rotate %0 by %c126_i32_120 dim 1 : vector<8x128xf32>, i32 -> vector<8x128xf32>
    %c126_i32_121 = arith.constant 126 : i32
    %631 = tpu.dynamic_rotate %1 by %c126_i32_121 dim 1 : vector<8x128xf32>, i32 -> vector<8x128xf32>
    %c127_i32_122 = arith.constant 127 : i32
    %632 = tpu.dynamic_rotate %0 by %c127_i32_122 dim 1 : vector<8x128xf32>, i32 -> vector<8x128xf32>
    %c127_i32_123 = arith.constant 127 : i32
    %633 = tpu.dynamic_rotate %1 by %c127_i32_123 dim 1 : vector<8x128xf32>, i32 -> vector<8x128xf32>
    %634 = arith.mulf %630, %632 : vector<8x128xf32>
    %635 = arith.mulf %631, %633 : vector<8x128xf32>
    %636 = arith.addf %634, %635 : vector<8x128xf32>
    %637 = arith.mulf %631, %632 : vector<8x128xf32>
    %638 = arith.mulf %630, %633 : vector<8x128xf32>
    %639 = arith.subf %637, %638 : vector<8x128xf32>
    %c25 = arith.constant 25 : index
    %640 = memref.load %arg1[%c25] : memref<36xf32, #tpu.memory_space<smem>>
    %c25_124 = arith.constant 25 : index
    %641 = memref.load %arg2[%c25_124] : memref<36xf32, #tpu.memory_space<smem>>
    %642 = vector.broadcast %640 : f32 to vector<8x128xf32>
    %643 = arith.mulf %642, %636 : vector<8x128xf32>
    %644 = vector.broadcast %641 : f32 to vector<8x128xf32>
    %645 = arith.mulf %644, %639 : vector<8x128xf32>
    %646 = arith.subf %643, %645 : vector<8x128xf32>
    %647 = vector.broadcast %640 : f32 to vector<8x128xf32>
    %648 = arith.mulf %647, %639 : vector<8x128xf32>
    %649 = vector.broadcast %641 : f32 to vector<8x128xf32>
    %650 = arith.mulf %649, %636 : vector<8x128xf32>
    %651 = arith.addf %648, %650 : vector<8x128xf32>
    %652 = arith.addf %624, %646 : vector<8x128xf32>
    %653 = arith.addf %629, %651 : vector<8x128xf32>
    %c127_i32_125 = arith.constant 127 : i32
    %654 = tpu.dynamic_rotate %0 by %c127_i32_125 dim 1 : vector<8x128xf32>, i32 -> vector<8x128xf32>
    %c127_i32_126 = arith.constant 127 : i32
    %655 = tpu.dynamic_rotate %1 by %c127_i32_126 dim 1 : vector<8x128xf32>, i32 -> vector<8x128xf32>
    %656 = arith.mulf %654, %0 : vector<8x128xf32>
    %657 = arith.mulf %655, %1 : vector<8x128xf32>
    %658 = arith.addf %656, %657 : vector<8x128xf32>
    %659 = arith.mulf %655, %0 : vector<8x128xf32>
    %660 = arith.mulf %654, %1 : vector<8x128xf32>
    %661 = arith.subf %659, %660 : vector<8x128xf32>
    %c26 = arith.constant 26 : index
    %662 = memref.load %arg1[%c26] : memref<36xf32, #tpu.memory_space<smem>>
    %c26_127 = arith.constant 26 : index
    %663 = memref.load %arg2[%c26_127] : memref<36xf32, #tpu.memory_space<smem>>
    %664 = vector.broadcast %662 : f32 to vector<8x128xf32>
    %665 = arith.mulf %664, %658 : vector<8x128xf32>
    %666 = vector.broadcast %663 : f32 to vector<8x128xf32>
    %667 = arith.mulf %666, %661 : vector<8x128xf32>
    %668 = arith.subf %665, %667 : vector<8x128xf32>
    %669 = vector.broadcast %662 : f32 to vector<8x128xf32>
    %670 = arith.mulf %669, %661 : vector<8x128xf32>
    %671 = vector.broadcast %663 : f32 to vector<8x128xf32>
    %672 = arith.mulf %671, %658 : vector<8x128xf32>
    %673 = arith.addf %670, %672 : vector<8x128xf32>
    %674 = arith.addf %652, %668 : vector<8x128xf32>
    %675 = arith.addf %653, %673 : vector<8x128xf32>
    %c1_i32_128 = arith.constant 1 : i32
    %676 = tpu.dynamic_rotate %0 by %c1_i32_128 dim 1 : vector<8x128xf32>, i32 -> vector<8x128xf32>
    %c1_i32_129 = arith.constant 1 : i32
    %677 = tpu.dynamic_rotate %1 by %c1_i32_129 dim 1 : vector<8x128xf32>, i32 -> vector<8x128xf32>
    %678 = arith.mulf %0, %676 : vector<8x128xf32>
    %679 = arith.mulf %1, %677 : vector<8x128xf32>
    %680 = arith.addf %678, %679 : vector<8x128xf32>
    %681 = arith.mulf %1, %676 : vector<8x128xf32>
    %682 = arith.mulf %0, %677 : vector<8x128xf32>
    %683 = arith.subf %681, %682 : vector<8x128xf32>
    %c27 = arith.constant 27 : index
    %684 = memref.load %arg1[%c27] : memref<36xf32, #tpu.memory_space<smem>>
    %c27_130 = arith.constant 27 : index
    %685 = memref.load %arg2[%c27_130] : memref<36xf32, #tpu.memory_space<smem>>
    %686 = vector.broadcast %684 : f32 to vector<8x128xf32>
    %687 = arith.mulf %686, %680 : vector<8x128xf32>
    %688 = vector.broadcast %685 : f32 to vector<8x128xf32>
    %689 = arith.mulf %688, %683 : vector<8x128xf32>
    %690 = arith.subf %687, %689 : vector<8x128xf32>
    %691 = vector.broadcast %684 : f32 to vector<8x128xf32>
    %692 = arith.mulf %691, %683 : vector<8x128xf32>
    %693 = vector.broadcast %685 : f32 to vector<8x128xf32>
    %694 = arith.mulf %693, %680 : vector<8x128xf32>
    %695 = arith.addf %692, %694 : vector<8x128xf32>
    %696 = arith.addf %674, %690 : vector<8x128xf32>
    %697 = arith.addf %675, %695 : vector<8x128xf32>
    %c1_i32_131 = arith.constant 1 : i32
    %698 = tpu.dynamic_rotate %0 by %c1_i32_131 dim 1 : vector<8x128xf32>, i32 -> vector<8x128xf32>
    %c1_i32_132 = arith.constant 1 : i32
    %699 = tpu.dynamic_rotate %1 by %c1_i32_132 dim 1 : vector<8x128xf32>, i32 -> vector<8x128xf32>
    %c2_i32_133 = arith.constant 2 : i32
    %700 = tpu.dynamic_rotate %0 by %c2_i32_133 dim 1 : vector<8x128xf32>, i32 -> vector<8x128xf32>
    %c2_i32_134 = arith.constant 2 : i32
    %701 = tpu.dynamic_rotate %1 by %c2_i32_134 dim 1 : vector<8x128xf32>, i32 -> vector<8x128xf32>
    %702 = arith.mulf %698, %700 : vector<8x128xf32>
    %703 = arith.mulf %699, %701 : vector<8x128xf32>
    %704 = arith.addf %702, %703 : vector<8x128xf32>
    %705 = arith.mulf %699, %700 : vector<8x128xf32>
    %706 = arith.mulf %698, %701 : vector<8x128xf32>
    %707 = arith.subf %705, %706 : vector<8x128xf32>
    %c28 = arith.constant 28 : index
    %708 = memref.load %arg1[%c28] : memref<36xf32, #tpu.memory_space<smem>>
    %c28_135 = arith.constant 28 : index
    %709 = memref.load %arg2[%c28_135] : memref<36xf32, #tpu.memory_space<smem>>
    %710 = vector.broadcast %708 : f32 to vector<8x128xf32>
    %711 = arith.mulf %710, %704 : vector<8x128xf32>
    %712 = vector.broadcast %709 : f32 to vector<8x128xf32>
    %713 = arith.mulf %712, %707 : vector<8x128xf32>
    %714 = arith.subf %711, %713 : vector<8x128xf32>
    %715 = vector.broadcast %708 : f32 to vector<8x128xf32>
    %716 = arith.mulf %715, %707 : vector<8x128xf32>
    %717 = vector.broadcast %709 : f32 to vector<8x128xf32>
    %718 = arith.mulf %717, %704 : vector<8x128xf32>
    %719 = arith.addf %716, %718 : vector<8x128xf32>
    %720 = arith.addf %696, %714 : vector<8x128xf32>
    %721 = arith.addf %697, %719 : vector<8x128xf32>
    %c2_i32_136 = arith.constant 2 : i32
    %722 = tpu.dynamic_rotate %0 by %c2_i32_136 dim 1 : vector<8x128xf32>, i32 -> vector<8x128xf32>
    %c2_i32_137 = arith.constant 2 : i32
    %723 = tpu.dynamic_rotate %1 by %c2_i32_137 dim 1 : vector<8x128xf32>, i32 -> vector<8x128xf32>
    %c3_i32 = arith.constant 3 : i32
    %724 = tpu.dynamic_rotate %0 by %c3_i32 dim 1 : vector<8x128xf32>, i32 -> vector<8x128xf32>
    %c3_i32_138 = arith.constant 3 : i32
    %725 = tpu.dynamic_rotate %1 by %c3_i32_138 dim 1 : vector<8x128xf32>, i32 -> vector<8x128xf32>
    %726 = arith.mulf %722, %724 : vector<8x128xf32>
    %727 = arith.mulf %723, %725 : vector<8x128xf32>
    %728 = arith.addf %726, %727 : vector<8x128xf32>
    %729 = arith.mulf %723, %724 : vector<8x128xf32>
    %730 = arith.mulf %722, %725 : vector<8x128xf32>
    %731 = arith.subf %729, %730 : vector<8x128xf32>
    %c29 = arith.constant 29 : index
    %732 = memref.load %arg1[%c29] : memref<36xf32, #tpu.memory_space<smem>>
    %c29_139 = arith.constant 29 : index
    %733 = memref.load %arg2[%c29_139] : memref<36xf32, #tpu.memory_space<smem>>
    %734 = vector.broadcast %732 : f32 to vector<8x128xf32>
    %735 = arith.mulf %734, %728 : vector<8x128xf32>
    %736 = vector.broadcast %733 : f32 to vector<8x128xf32>
    %737 = arith.mulf %736, %731 : vector<8x128xf32>
    %738 = arith.subf %735, %737 : vector<8x128xf32>
    %739 = vector.broadcast %732 : f32 to vector<8x128xf32>
    %740 = arith.mulf %739, %731 : vector<8x128xf32>
    %741 = vector.broadcast %733 : f32 to vector<8x128xf32>
    %742 = arith.mulf %741, %728 : vector<8x128xf32>
    %743 = arith.addf %740, %742 : vector<8x128xf32>
    %744 = arith.addf %720, %738 : vector<8x128xf32>
    %745 = arith.addf %721, %743 : vector<8x128xf32>
    %c4_i32_140 = arith.constant 4 : i32
    %746 = tpu.dynamic_rotate %744 by %c4_i32_140 dim 0 : vector<8x128xf32>, i32 -> vector<8x128xf32>
    %747 = arith.addf %744, %746 : vector<8x128xf32>
    %c4_i32_141 = arith.constant 4 : i32
    %748 = tpu.dynamic_rotate %745 by %c4_i32_141 dim 0 : vector<8x128xf32>, i32 -> vector<8x128xf32>
    %749 = arith.addf %745, %748 : vector<8x128xf32>
    %c1_i32_142 = arith.constant 1 : i32
    %750 = tpu.dynamic_rotate %0 by %c1_i32_142 dim 1 : vector<8x128xf32>, i32 -> vector<8x128xf32>
    %c1_i32_143 = arith.constant 1 : i32
    %751 = tpu.dynamic_rotate %1 by %c1_i32_143 dim 1 : vector<8x128xf32>, i32 -> vector<8x128xf32>
    %752 = arith.mulf %747, %750 : vector<8x128xf32>
    %753 = arith.mulf %749, %751 : vector<8x128xf32>
    %754 = arith.subf %752, %753 : vector<8x128xf32>
    %755 = arith.mulf %747, %751 : vector<8x128xf32>
    %756 = arith.mulf %749, %750 : vector<8x128xf32>
    %757 = arith.addf %755, %756 : vector<8x128xf32>
    %758 = arith.addf %606, %754 : vector<8x128xf32>
    %759 = arith.addf %607, %757 : vector<8x128xf32>
    %c125_i32_144 = arith.constant 125 : i32
    %760 = tpu.dynamic_rotate %0 by %c125_i32_144 dim 1 : vector<8x128xf32>, i32 -> vector<8x128xf32>
    %c125_i32_145 = arith.constant 125 : i32
    %761 = tpu.dynamic_rotate %1 by %c125_i32_145 dim 1 : vector<8x128xf32>, i32 -> vector<8x128xf32>
    %c127_i32_146 = arith.constant 127 : i32
    %762 = tpu.dynamic_rotate %0 by %c127_i32_146 dim 1 : vector<8x128xf32>, i32 -> vector<8x128xf32>
    %c127_i32_147 = arith.constant 127 : i32
    %763 = tpu.dynamic_rotate %1 by %c127_i32_147 dim 1 : vector<8x128xf32>, i32 -> vector<8x128xf32>
    %764 = arith.mulf %760, %762 : vector<8x128xf32>
    %765 = arith.mulf %761, %763 : vector<8x128xf32>
    %766 = arith.addf %764, %765 : vector<8x128xf32>
    %767 = arith.mulf %761, %762 : vector<8x128xf32>
    %768 = arith.mulf %760, %763 : vector<8x128xf32>
    %769 = arith.subf %767, %768 : vector<8x128xf32>
    %c30 = arith.constant 30 : index
    %770 = memref.load %arg1[%c30] : memref<36xf32, #tpu.memory_space<smem>>
    %c30_148 = arith.constant 30 : index
    %771 = memref.load %arg2[%c30_148] : memref<36xf32, #tpu.memory_space<smem>>
    %772 = vector.broadcast %770 : f32 to vector<8x128xf32>
    %773 = arith.mulf %772, %766 : vector<8x128xf32>
    %774 = vector.broadcast %771 : f32 to vector<8x128xf32>
    %775 = arith.mulf %774, %769 : vector<8x128xf32>
    %776 = arith.subf %773, %775 : vector<8x128xf32>
    %777 = vector.broadcast %770 : f32 to vector<8x128xf32>
    %778 = arith.mulf %777, %769 : vector<8x128xf32>
    %779 = vector.broadcast %771 : f32 to vector<8x128xf32>
    %780 = arith.mulf %779, %766 : vector<8x128xf32>
    %781 = arith.addf %778, %780 : vector<8x128xf32>
    %c126_i32_149 = arith.constant 126 : i32
    %782 = tpu.dynamic_rotate %0 by %c126_i32_149 dim 1 : vector<8x128xf32>, i32 -> vector<8x128xf32>
    %c126_i32_150 = arith.constant 126 : i32
    %783 = tpu.dynamic_rotate %1 by %c126_i32_150 dim 1 : vector<8x128xf32>, i32 -> vector<8x128xf32>
    %784 = arith.mulf %782, %0 : vector<8x128xf32>
    %785 = arith.mulf %783, %1 : vector<8x128xf32>
    %786 = arith.addf %784, %785 : vector<8x128xf32>
    %787 = arith.mulf %783, %0 : vector<8x128xf32>
    %788 = arith.mulf %782, %1 : vector<8x128xf32>
    %789 = arith.subf %787, %788 : vector<8x128xf32>
    %c31 = arith.constant 31 : index
    %790 = memref.load %arg1[%c31] : memref<36xf32, #tpu.memory_space<smem>>
    %c31_151 = arith.constant 31 : index
    %791 = memref.load %arg2[%c31_151] : memref<36xf32, #tpu.memory_space<smem>>
    %792 = vector.broadcast %790 : f32 to vector<8x128xf32>
    %793 = arith.mulf %792, %786 : vector<8x128xf32>
    %794 = vector.broadcast %791 : f32 to vector<8x128xf32>
    %795 = arith.mulf %794, %789 : vector<8x128xf32>
    %796 = arith.subf %793, %795 : vector<8x128xf32>
    %797 = vector.broadcast %790 : f32 to vector<8x128xf32>
    %798 = arith.mulf %797, %789 : vector<8x128xf32>
    %799 = vector.broadcast %791 : f32 to vector<8x128xf32>
    %800 = arith.mulf %799, %786 : vector<8x128xf32>
    %801 = arith.addf %798, %800 : vector<8x128xf32>
    %802 = arith.addf %776, %796 : vector<8x128xf32>
    %803 = arith.addf %781, %801 : vector<8x128xf32>
    %c127_i32_152 = arith.constant 127 : i32
    %804 = tpu.dynamic_rotate %0 by %c127_i32_152 dim 1 : vector<8x128xf32>, i32 -> vector<8x128xf32>
    %c127_i32_153 = arith.constant 127 : i32
    %805 = tpu.dynamic_rotate %1 by %c127_i32_153 dim 1 : vector<8x128xf32>, i32 -> vector<8x128xf32>
    %c1_i32_154 = arith.constant 1 : i32
    %806 = tpu.dynamic_rotate %0 by %c1_i32_154 dim 1 : vector<8x128xf32>, i32 -> vector<8x128xf32>
    %c1_i32_155 = arith.constant 1 : i32
    %807 = tpu.dynamic_rotate %1 by %c1_i32_155 dim 1 : vector<8x128xf32>, i32 -> vector<8x128xf32>
    %808 = arith.mulf %804, %806 : vector<8x128xf32>
    %809 = arith.mulf %805, %807 : vector<8x128xf32>
    %810 = arith.addf %808, %809 : vector<8x128xf32>
    %811 = arith.mulf %805, %806 : vector<8x128xf32>
    %812 = arith.mulf %804, %807 : vector<8x128xf32>
    %813 = arith.subf %811, %812 : vector<8x128xf32>
    %c32 = arith.constant 32 : index
    %814 = memref.load %arg1[%c32] : memref<36xf32, #tpu.memory_space<smem>>
    %c32_156 = arith.constant 32 : index
    %815 = memref.load %arg2[%c32_156] : memref<36xf32, #tpu.memory_space<smem>>
    %816 = vector.broadcast %814 : f32 to vector<8x128xf32>
    %817 = arith.mulf %816, %810 : vector<8x128xf32>
    %818 = vector.broadcast %815 : f32 to vector<8x128xf32>
    %819 = arith.mulf %818, %813 : vector<8x128xf32>
    %820 = arith.subf %817, %819 : vector<8x128xf32>
    %821 = vector.broadcast %814 : f32 to vector<8x128xf32>
    %822 = arith.mulf %821, %813 : vector<8x128xf32>
    %823 = vector.broadcast %815 : f32 to vector<8x128xf32>
    %824 = arith.mulf %823, %810 : vector<8x128xf32>
    %825 = arith.addf %822, %824 : vector<8x128xf32>
    %826 = arith.addf %802, %820 : vector<8x128xf32>
    %827 = arith.addf %803, %825 : vector<8x128xf32>
    %c2_i32_157 = arith.constant 2 : i32
    %828 = tpu.dynamic_rotate %0 by %c2_i32_157 dim 1 : vector<8x128xf32>, i32 -> vector<8x128xf32>
    %c2_i32_158 = arith.constant 2 : i32
    %829 = tpu.dynamic_rotate %1 by %c2_i32_158 dim 1 : vector<8x128xf32>, i32 -> vector<8x128xf32>
    %830 = arith.mulf %0, %828 : vector<8x128xf32>
    %831 = arith.mulf %1, %829 : vector<8x128xf32>
    %832 = arith.addf %830, %831 : vector<8x128xf32>
    %833 = arith.mulf %1, %828 : vector<8x128xf32>
    %834 = arith.mulf %0, %829 : vector<8x128xf32>
    %835 = arith.subf %833, %834 : vector<8x128xf32>
    %c33 = arith.constant 33 : index
    %836 = memref.load %arg1[%c33] : memref<36xf32, #tpu.memory_space<smem>>
    %c33_159 = arith.constant 33 : index
    %837 = memref.load %arg2[%c33_159] : memref<36xf32, #tpu.memory_space<smem>>
    %838 = vector.broadcast %836 : f32 to vector<8x128xf32>
    %839 = arith.mulf %838, %832 : vector<8x128xf32>
    %840 = vector.broadcast %837 : f32 to vector<8x128xf32>
    %841 = arith.mulf %840, %835 : vector<8x128xf32>
    %842 = arith.subf %839, %841 : vector<8x128xf32>
    %843 = vector.broadcast %836 : f32 to vector<8x128xf32>
    %844 = arith.mulf %843, %835 : vector<8x128xf32>
    %845 = vector.broadcast %837 : f32 to vector<8x128xf32>
    %846 = arith.mulf %845, %832 : vector<8x128xf32>
    %847 = arith.addf %844, %846 : vector<8x128xf32>
    %848 = arith.addf %826, %842 : vector<8x128xf32>
    %849 = arith.addf %827, %847 : vector<8x128xf32>
    %c1_i32_160 = arith.constant 1 : i32
    %850 = tpu.dynamic_rotate %0 by %c1_i32_160 dim 1 : vector<8x128xf32>, i32 -> vector<8x128xf32>
    %c1_i32_161 = arith.constant 1 : i32
    %851 = tpu.dynamic_rotate %1 by %c1_i32_161 dim 1 : vector<8x128xf32>, i32 -> vector<8x128xf32>
    %c3_i32_162 = arith.constant 3 : i32
    %852 = tpu.dynamic_rotate %0 by %c3_i32_162 dim 1 : vector<8x128xf32>, i32 -> vector<8x128xf32>
    %c3_i32_163 = arith.constant 3 : i32
    %853 = tpu.dynamic_rotate %1 by %c3_i32_163 dim 1 : vector<8x128xf32>, i32 -> vector<8x128xf32>
    %854 = arith.mulf %850, %852 : vector<8x128xf32>
    %855 = arith.mulf %851, %853 : vector<8x128xf32>
    %856 = arith.addf %854, %855 : vector<8x128xf32>
    %857 = arith.mulf %851, %852 : vector<8x128xf32>
    %858 = arith.mulf %850, %853 : vector<8x128xf32>
    %859 = arith.subf %857, %858 : vector<8x128xf32>
    %c34 = arith.constant 34 : index
    %860 = memref.load %arg1[%c34] : memref<36xf32, #tpu.memory_space<smem>>
    %c34_164 = arith.constant 34 : index
    %861 = memref.load %arg2[%c34_164] : memref<36xf32, #tpu.memory_space<smem>>
    %862 = vector.broadcast %860 : f32 to vector<8x128xf32>
    %863 = arith.mulf %862, %856 : vector<8x128xf32>
    %864 = vector.broadcast %861 : f32 to vector<8x128xf32>
    %865 = arith.mulf %864, %859 : vector<8x128xf32>
    %866 = arith.subf %863, %865 : vector<8x128xf32>
    %867 = vector.broadcast %860 : f32 to vector<8x128xf32>
    %868 = arith.mulf %867, %859 : vector<8x128xf32>
    %869 = vector.broadcast %861 : f32 to vector<8x128xf32>
    %870 = arith.mulf %869, %856 : vector<8x128xf32>
    %871 = arith.addf %868, %870 : vector<8x128xf32>
    %872 = arith.addf %848, %866 : vector<8x128xf32>
    %873 = arith.addf %849, %871 : vector<8x128xf32>
    %c2_i32_165 = arith.constant 2 : i32
    %874 = tpu.dynamic_rotate %0 by %c2_i32_165 dim 1 : vector<8x128xf32>, i32 -> vector<8x128xf32>
    %c2_i32_166 = arith.constant 2 : i32
    %875 = tpu.dynamic_rotate %1 by %c2_i32_166 dim 1 : vector<8x128xf32>, i32 -> vector<8x128xf32>
    %c4_i32_167 = arith.constant 4 : i32
    %876 = tpu.dynamic_rotate %0 by %c4_i32_167 dim 1 : vector<8x128xf32>, i32 -> vector<8x128xf32>
    %c4_i32_168 = arith.constant 4 : i32
    %877 = tpu.dynamic_rotate %1 by %c4_i32_168 dim 1 : vector<8x128xf32>, i32 -> vector<8x128xf32>
    %878 = arith.mulf %874, %876 : vector<8x128xf32>
    %879 = arith.mulf %875, %877 : vector<8x128xf32>
    %880 = arith.addf %878, %879 : vector<8x128xf32>
    %881 = arith.mulf %875, %876 : vector<8x128xf32>
    %882 = arith.mulf %874, %877 : vector<8x128xf32>
    %883 = arith.subf %881, %882 : vector<8x128xf32>
    %c35 = arith.constant 35 : index
    %884 = memref.load %arg1[%c35] : memref<36xf32, #tpu.memory_space<smem>>
    %c35_169 = arith.constant 35 : index
    %885 = memref.load %arg2[%c35_169] : memref<36xf32, #tpu.memory_space<smem>>
    %886 = vector.broadcast %884 : f32 to vector<8x128xf32>
    %887 = arith.mulf %886, %880 : vector<8x128xf32>
    %888 = vector.broadcast %885 : f32 to vector<8x128xf32>
    %889 = arith.mulf %888, %883 : vector<8x128xf32>
    %890 = arith.subf %887, %889 : vector<8x128xf32>
    %891 = vector.broadcast %884 : f32 to vector<8x128xf32>
    %892 = arith.mulf %891, %883 : vector<8x128xf32>
    %893 = vector.broadcast %885 : f32 to vector<8x128xf32>
    %894 = arith.mulf %893, %880 : vector<8x128xf32>
    %895 = arith.addf %892, %894 : vector<8x128xf32>
    %896 = arith.addf %872, %890 : vector<8x128xf32>
    %897 = arith.addf %873, %895 : vector<8x128xf32>
    %c4_i32_170 = arith.constant 4 : i32
    %898 = tpu.dynamic_rotate %896 by %c4_i32_170 dim 0 : vector<8x128xf32>, i32 -> vector<8x128xf32>
    %899 = arith.addf %896, %898 : vector<8x128xf32>
    %c4_i32_171 = arith.constant 4 : i32
    %900 = tpu.dynamic_rotate %897 by %c4_i32_171 dim 0 : vector<8x128xf32>, i32 -> vector<8x128xf32>
    %901 = arith.addf %897, %900 : vector<8x128xf32>
    %c2_i32_172 = arith.constant 2 : i32
    %902 = tpu.dynamic_rotate %0 by %c2_i32_172 dim 1 : vector<8x128xf32>, i32 -> vector<8x128xf32>
    %c2_i32_173 = arith.constant 2 : i32
    %903 = tpu.dynamic_rotate %1 by %c2_i32_173 dim 1 : vector<8x128xf32>, i32 -> vector<8x128xf32>
    %904 = arith.mulf %899, %902 : vector<8x128xf32>
    %905 = arith.mulf %901, %903 : vector<8x128xf32>
    %906 = arith.subf %904, %905 : vector<8x128xf32>
    %907 = arith.mulf %899, %903 : vector<8x128xf32>
    %908 = arith.mulf %901, %902 : vector<8x128xf32>
    %909 = arith.addf %907, %908 : vector<8x128xf32>
    %910 = arith.addf %758, %906 : vector<8x128xf32>
    %911 = arith.addf %759, %909 : vector<8x128xf32>
    %c0_174 = arith.constant 0 : index
    %c0_175 = arith.constant 0 : index
    %912 = vector.load %arg4[%c0_174, %c0_175] : memref<16x128xf32, #tpu.memory_space<vmem>>, vector<8x128xf32>
    tpu.vector_store %arg4[%c0_174, %c0_175], %910 {strides = array<i32>} : memref<16x128xf32, #tpu.memory_space<vmem>>, vector<8x128xf32>,
    %c8_176 = arith.constant 8 : index
    %c0_177 = arith.constant 0 : index
    %913 = vector.load %arg4[%c8_176, %c0_177] : memref<16x128xf32, #tpu.memory_space<vmem>>, vector<8x128xf32>
    tpu.vector_store %arg4[%c8_176, %c0_177], %911 {strides = array<i32>} : memref<16x128xf32, #tpu.memory_space<vmem>>, vector<8x128xf32>,
    return
  }
  func.func @transform_0(%arg0: i32) -> i32 {
    %c0_i32 = arith.constant 0 : i32
    %c0_i32_0 = arith.constant 0 : i32
    return %c0_i32 : i32
  }
  func.func @transform_1(%arg0: i32) -> i32 {
    %c0_i32 = arith.constant 0 : i32
    %c0_i32_0 = arith.constant 0 : i32
    return %c0_i32 : i32
  }
  func.func @transform_2(%arg0: i32) -> (i32, i32) {
    %c0_i32 = arith.constant 0 : i32
    %c0_i32_0 = arith.constant 0 : i32
    return %arg0, %c0_i32 : i32, i32
  }
  func.func @transform_3(%arg0: i32) -> (i32, i32) {
    %c0_i32 = arith.constant 0 : i32
    %c0_i32_0 = arith.constant 0 : i32
    return %arg0, %c0_i32 : i32, i32
  }
}

</mosaic_0001>

<bundles_post_ra>
// kernel: tpu_custom_call.1
= control target key start
LH: loop header
LB: loop body
LE: loop exit
PB: predicated region body
PF: predicated region fallthrough
CT: control target
= control target key end

     0   :  { %8 = vsyncpa [#allocation5], 0  ;;  %s1857_s0 = inlined_call_operand.hbm [shape: f32[36], index: 0, kind: input, shape index: {}]   ;;  %s1858_s1 = inlined_call_operand.hbm [shape: f32[36], index: 1, kind: input, shape index: {}]   ;;  %s1859_s2 = inlined_call_operand.hbm [shape: f32[16,128], index: 2, kind: input, shape index: {}]   ;;  %s1860_s3 = inlined_call_operand.hbm [shape: f32[16,128], index: 3, kind: output, shape index: {}]  }
   0x1   :  { %9 = vsyncpa [#allocation7], 0 }
   0x2   :  { %10 = vsyncpa [#allocation3], 0 }
   0x3   :  { %11 = vsyncpa [#allocation4], 0  ;;  %s17_s14 = sshll.u32 %s1857_s0, 4  ;;  %s26_s17 = sshll.u32 %s1858_s1, 4  ;;  %s18_s14 = int_to_ptr.hbm [resolvable:$true] %s17_s14  ;;  %s27_s17 = int_to_ptr.hbm [resolvable:$true] %s26_s17 }
   0x4   :  { %s944_s18 = smov [#allocation2]   ;;  %s945_s19 = smov [#allocation6]  }
   0x5   :  { %20 = dma.hbm_to_smem %s18_s14, 16, %s944_s18, [#allocation5]  }
   0x6   :  { %29 = dma.hbm_to_smem %s27_s17, 16, %s945_s19, [#allocation7]  }
   0x7   :  { %s34_s22 = sshll.u32 %s1859_s2, 4  ;;  %s946_s23 = smov [#allocation8]   ;;  %s35_s22 = int_to_ptr.hbm [resolvable:$true] %s34_s22 }
   0x8   :  { %s36_s24 = sshll.u32 %s946_s23, 4  ;;  %s947_s25 = smov 128   ;;  %s37_s24 = int_to_ptr.vmem [resolvable:$true] %s36_s24 }
   0x9   :  { %s948_s0 = smov 8  }
   0xa   :  { %42 = dma.hbm_to_vmem [thread:$0]  %s35_s22, 256, %s37_s24, [#allocation3], %s947_s25, %s947_s25, %s948_s0  }
   0xb   :  { %936 = dma.done.wait [#allocation5], 16  }
   0xc   :  { %937 = vsyncadd [#allocation5], 4294967280 }
   0xd   :  { %938 = dma.done.wait [#allocation7], 16  }
   0xe   :  { %939 = vsyncadd [#allocation7], 4294967280 }
   0xf   :  { %940 = dma.done.wait [#allocation3], 256  }
  0x10   :  { %941 = vsyncadd [#allocation3], 4294967040 }
  0x11   :  { %55 = sfence }
  0x12   :  { %v992_v0 = vld [vmem:[#allocation8] sm:$0xff]  ;;  %s949_s1 = smov 126   ;;  %s950_s2 = smov 122   ;;  %v997_v1 = vld [vmem:[#allocation8 + $0x8] sm:$0xff] }
  0x13   :  { %82 = vrot.lane.b32.xlu2 %v992_v0, %s949_s1  ;;  %62 = vrot.lane.b32.xlu1 %v992_v0, %s950_s2  ;;  %s951_s26 = smov 125   ;;  %s952_s27 = smov 124  }
  0x14   :  { %58 = vrot.lane.b32.xlu0 %v992_v0, %s951_s26  ;;  %s953_s28 = smov 123   ;;  %s954_s29 = smov 127  }
  0x15   :  { %s955_s30 = smov 1   ;;  %s956_s4 = smov 2  }
  0x16   :  { %s957_s5 = smov 3   ;;  %s958_s6 = smov 4  }
  0x17   :  { %s1018_s7 = sld [smem:[#allocation2]] }
  0x18   :  { %s1020_s8 = sld [smem:[#allocation6]] }
  0x19   :  { %s1022_s9 = sld [smem:[#allocation2 + $0x1]] }
  0x1a   :  { %s1024_s10 = sld [smem:[#allocation6 + $0x1]] }
  0x1b   :  { %84 = vrot.lane.b32.xlu2 %v997_v1, %s949_s1  ;;  %64 = vrot.lane.b32.xlu1 %v997_v1, %s950_s2  ;;  %s1026_s11 = sld [smem:[#allocation2 + $0x6]] }
  0x1c   :  { %60 = vrot.lane.b32.xlu0 %v997_v1, %s951_s26  ;;  %s1028_s12 = sld [smem:[#allocation6 + $0x6]] }
  0x1d   :  { %s1030_s13 = sld [smem:[#allocation2 + $0x2]]  ;;  %v74_v19 = vstv %s1018_s7 }
  0x1e   :  { %s1034_s14 = sld [smem:[#allocation6 + $0x2]]  ;;  %v76_v20 = vstv %s1020_s8 }
  0x1f   :  { %s1036_s15 = sld [smem:[#allocation2 + $0x3]]  ;;  %v98_v22 = vstv %s1022_s9 }
  0x20   :  { %s1038_s16 = sld [smem:[#allocation6 + $0x3]]  ;;  %v100_v26 = vstv %s1024_s10 }
  0x21   :  { %s792_s17 = sld [smem:[#allocation2 + $0x9]]  ;;  %v214_v27 = vstv %s1026_s11 }
  0x22   :  { %s793_s18 = sld [smem:[#allocation6 + $0x9]]  ;;  %v216_v28 = vstv %s1028_s12 }
  0x23   :  { %112 = vrot.lane.b32.xlu2 %v992_v0, %s952_s27  ;;  %88 = vrot.lane.b32.xlu1 %v997_v1, %s953_s28  ;;  %s1040_s19 = sld [smem:[#allocation2 + $0x7]] }
  0x24   :  { %86 = vrot.lane.b32.xlu0 %v992_v0, %s953_s28  ;;  %s1042_s20 = sld [smem:[#allocation6 + $0x7]] }
  0x25   :  { %s1044_s21 = sld [smem:[#allocation2 + $0x8]]  ;;  %v142_v21 = vstv %s1036_s15 }
  0x26   :  { %s1054_s22 = sld [smem:[#allocation6 + $0x8]]  ;;  %v144_v23 = vstv %s1038_s16 }
  0x27   :  { %s1056_s23 = sld [smem:[#allocation2 + $0xd]]  ;;  %v266_v11 = vstv %s792_s17 }
  0x28   :  { %s1060_s24 = sld [smem:[#allocation6 + $0xd]]  ;;  %v268_v12 = vstv %s793_s18 }
  0x29   :  { %s1064_s1 = sld [smem:[#allocation2 + $0xc]] }
  0x2a   :  { %s1066_s2 = sld [smem:[#allocation6 + $0xc]] }
  0x2b   :  { %110 = vrot.lane.b32.xlu2 %v997_v1, %s954_s29  ;;  %108 = vrot.lane.b32.xlu1 %v992_v0, %s954_s29  ;;  %s1068_s26 = sld [smem:[#allocation2 + $0x1f]] }
  0x2c   :  { %114 = vrot.lane.b32.xlu0 %v997_v1, %s952_s27  ;;  %s1070_s27 = sld [smem:[#allocation6 + $0x1f]] }
  0x2d   :  { %s1079_s28 = sld [smem:[#allocation2 + $0xe]]  ;;  %v348_v24 = vstv %s1056_s23 }
  0x2e   :  { %s1082_s29 = sld [smem:[#allocation6 + $0xe]]  ;;  %v350_v25 = vstv %s1060_s24 }
  0x2f   :  { %s1376_s7 = sld [smem:[#allocation2 + $0x20]] }
  0x30   :  { %s1388_s8 = sld [smem:[#allocation6 + $0x20]] }
  0x31   :  { %v665_v42 = vstv %s1068_s26  ;;  %s1404_s9 = sld [smem:[#allocation2 + $0x21]] }
  0x32   :  { %v667_v43 = vstv %s1070_s27  ;;  %s1415_s10 = sld [smem:[#allocation6 + $0x21]] }
  0x33   :  { %154 = vrot.lane.b32.xlu1 %v997_v1, %s955_s30  ;;  %174 = vrot.lane.b32.xlu2 %v992_v0, %s956_s4  ;;  %s1450_s11 = sld [smem:[#allocation2 + $0x4]] }
  0x34   :  { %152 = vrot.lane.b32.xlu0 %v992_v0, %s955_s30  ;;  %s1169_s30 = sld [smem:[#allocation2 + $0x22]] }
  0x35   :  { %s1461_s12 = sld [smem:[#allocation6 + $0x4]] }
  0x36   :  { %s1491_s15 = sld [smem:[#allocation2 + $0x5]] }
  0x37   :  { %s1494_s16 = sld [smem:[#allocation6 + $0x5]] }
  0x38   :  { %s1510_s17 = sld [smem:[#allocation2 + $0xa]] }
  0x39   :  { %s1516_s18 = sld [smem:[#allocation6 + $0xa]] }
  0x3a   :  { %s1579_s23 = sld [smem:[#allocation2 + $0x10]] }
  0x3b   :  { %617 = vrot.lane.b32.xlu1 %v992_v0, %s957_s5  ;;  %619 = vrot.lane.b32.xlu2 %v997_v1, %s957_s5  ;;  %s1260_s5 = sld [smem:[#allocation2 + $0x1e]] }
  0x3c   :  { %176 = vrot.lane.b32.xlu0 %v997_v1, %s956_s4  ;;  %s1175_s4 = sld [smem:[#allocation6 + $0x22]] }
  0x3d   :  { %s1585_s24 = sld [smem:[#allocation6 + $0x10]] }
  0x3e   :  { %s1628_s26 = sld [smem:[#allocation2 + $0x12]] }
  0x3f   :  { %s1637_s27 = sld [smem:[#allocation6 + $0x12]] }
  0x43   :  { %721 = vrot.lane.b32.xlu1 %v997_v1, %s958_s6 }
  0x44   :  { %719 = vrot.lane.b32.xlu0 %v992_v0, %s958_s6  ;;  %s1364_s6 = sld [smem:[#allocation6 + $0x1e]] }
  0x6d   :  { %v1016_v2 = vpop.permute.xlu2 %82 }
  0x6e   :  { %v258_v4 = vmul.f32 %v1016_v2, %v992_v0  ;;  %v261_v6 = vmul.f32 %v1016_v2, %v997_v1 }
  0x75   :  { %v1032_v3 = vpop.permute.xlu2 %84 }
  0x76   :  { %v259_v5 = vmul.f32 %v1032_v3, %v997_v1  ;;  %v262_v7 = vmul.f32 %v1032_v3, %v992_v0 }
  0x78   :  { %v1062_v9 = vadd.f32 %v259_v5, %v258_v4  ;;  %v263_v10 = vsub.f32 %v261_v6, %v262_v7  ;;  %v662_v41 = vsub.f32 %v262_v7, %v261_v6 }
  0x7a   :  { %v1075_v15 = vmul.f32 %v266_v11, %v1062_v9  ;;  %v1077_v16 = vmul.f32 %v268_v12, %v263_v10  ;;  %v271_v17 = vmul.f32 %v266_v11, %v263_v10  ;;  %v272_v18 = vmul.f32 %v268_v12, %v1062_v9 }
  0x7b   :  { %v1145_v59 = vmul.f32 %v665_v42, %v1062_v9  ;;  %v1147_v60 = vmul.f32 %v667_v43, %v662_v41 }
  0x7c   :  { %v1107_v34 = vadd.f32 %v272_v18, %v271_v17  ;;  %v670_v18 = vmul.f32 %v665_v42, %v662_v41 }
  0x7d   :  { %v1058_v8 = vpop.permute.xlu2 %112 }
  0x7e   :  { %v1098_v30 = vmul.f32 %v1058_v8, %v1016_v2  ;;  %v1102_v31 = vmul.f32 %v1058_v8, %v1032_v3 }
  0x85   :  { %v63_v13 = vpop.permute.xlu1 %62  ;;  %v1104_v32 = vpop.permute.xlu2 %110 }
  0x86   :  { %v1072_v14 = vpop.permute.xlu0 %58  ;;  %v1126_v51 = vmul.f32 %v1058_v8, %v1104_v32  ;;  %v1136_v56 = vmul.f32 %v1104_v32, %v1032_v3  ;;  %v1167_v11 = vmul.f32 %v1104_v32, %v1016_v2 }
  0x87   :  { %1875 = vst [vmem:[#allocation14_spill] sm:$0xff] %v1072_v14  ;;  %v66_v53 = vmul.f32 %v63_v13, %v1072_v14  ;;  %v134_v63 = vmul.f32 %v1072_v14, %v992_v0  ;;  %v137_v4 = vmul.f32 %v1072_v14, %v997_v1  ;;  %v1157_v6 = vmul.f32 %v1104_v32, %v1072_v14 }
  0x88   :  { %v340_v7 = vmul.f32 %v1016_v2, %v1072_v14  ;;  %v1163_v10 = vmul.f32 %v1032_v3, %v1072_v14  ;;  %1879 = vst [vmem:[#allocation18_spill] sm:$0xff] %v1167_v11  ;;  %v1173_v17 = vmul.f32 %v1058_v8, %v1072_v14 }
  0x8a   :  { %1878 = vst [vmem:[#allocation17_spill] sm:$0xff] %v1163_v10 }
  0x8d   :  { %v65_v39 = vpop.permute.xlu1 %64  ;;  %v1153_v5 = vpop.permute.xlu2 %174 }
  0x8e   :  { %v70_v44 = vmul.f32 %v65_v39, %v1072_v14  ;;  %v1117_v45 = vpop.permute.xlu0 %60 }
  0x8f   :  { %1876 = vst [vmem:[#allocation15_spill] sm:$0xff] %v1117_v45  ;;  %v67_v49 = vmul.f32 %v65_v39, %v1117_v45  ;;  %v69_v50 = vmul.f32 %v63_v13, %v1117_v45  ;;  %v135_v54 = vmul.f32 %v1117_v45, %v997_v1  ;;  %v138_v55 = vmul.f32 %v1117_v45, %v992_v0 }
  0x90   :  { %v341_v57 = vmul.f32 %v1032_v3, %v1117_v45  ;;  %v1142_v58 = vmul.f32 %v1016_v2, %v1117_v45  ;;  %v1231_v48 = vmul.f32 %v1058_v8, %v1117_v45 }
  0x91   :  { %v68_v61 = vadd.f32 %v67_v49, %v66_v53  ;;  %v71_v62 = vsub.f32 %v69_v50, %v70_v44  ;;  %v136_v12 = vadd.f32 %v135_v54, %v134_v63  ;;  %v139_v13 = vsub.f32 %v137_v4, %v138_v55 }
  0x92   :  { %1877 = vst [vmem:[#allocation16_spill] sm:$0xff] %v1142_v58  ;;  %v1177_v44 = vadd.f32 %v341_v57, %v340_v7  ;;  %v345_v49 = vsub.f32 %v1163_v10, %v1142_v58  ;;  %v671_v53 = vmul.f32 %v667_v43, %v1062_v9 }
  0x93   :  { %v1186_v54 = vmul.f32 %v74_v19, %v68_v61  ;;  %v1190_v41 = vmul.f32 %v76_v20, %v71_v62  ;;  %v79_v42 = vmul.f32 %v74_v19, %v71_v62  ;;  %v80_v55 = vmul.f32 %v76_v20, %v68_v61 }
  0x94   :  { %1880 = vst [vmem:[#allocation19_spill] sm:$0xff] %v1177_v44  ;;  %v1202_v43 = vmul.f32 %v142_v21, %v136_v12  ;;  %v1206_v50 = vmul.f32 %v144_v23, %v139_v13  ;;  %v147_v19 = vmul.f32 %v142_v21, %v139_v13  ;;  %v148_v20 = vmul.f32 %v144_v23, %v136_v12 }
  0x95   :  { %v89_v39 = vpop.permute.xlu1 %88  ;;  %v1217_v29 = vmul.f32 %v348_v24, %v1177_v44  ;;  %v1221_v47 = vmul.f32 %v350_v25, %v345_v49  ;;  %v241_v21 = vmul.f32 %v1104_v32, %v1117_v45  ;;  %v1227_v23 = vadd.f32 %v671_v53, %v670_v18 }
  0x96   :  { %v87_v57 = vpop.permute.xlu0 %86  ;;  %v91_v63 = vmul.f32 %v89_v39, %v1032_v3  ;;  %v94_v4 = vmul.f32 %v89_v39, %v1016_v2  ;;  %v207_v61 = vmul.f32 %v89_v39, %v1117_v45  ;;  %v210_v46 = vmul.f32 %v89_v39, %v1072_v14 }
  0x97   :  { %v90_v7 = vmul.f32 %v87_v57, %v1016_v2  ;;  %v93_v9 = vmul.f32 %v87_v57, %v1032_v3  ;;  %v206_v62 = vmul.f32 %v87_v57, %v1072_v14  ;;  %v209_v52 = vmul.f32 %v87_v57, %v1117_v45 }
  0x98   :  { %v78_v40 = vsub.f32 %v1186_v54, %v1190_v41  ;;  %v1236_v39 = vadd.f32 %v80_v55, %v79_v42  ;;  %v353_v54 = vmul.f32 %v348_v24, %v345_v49  ;;  %v1249_v41 = vpop.permute.xlu2 %619 }
  0x99   :  { %v92_v12 = vadd.f32 %v91_v63, %v90_v7  ;;  %v95_v13 = vsub.f32 %v93_v9, %v94_v4  ;;  %v208_v53 = vadd.f32 %v207_v61, %v206_v62  ;;  %v1243_v4 = vadd.f32 %v148_v20, %v147_v19  ;;  %1881 = vst [vmem:[#allocation20_spill] sm:$0xff] %v1249_v41 }
  0x9a   :  { %v211_v42 = vsub.f32 %v209_v52, %v210_v46  ;;  %v354_v9 = vmul.f32 %v350_v25, %v1177_v44  ;;  %v1258_v19 = vmul.f32 %v1249_v41, %v1153_v5  ;;  %v1276_v62 = vmul.f32 %v1153_v5, %v992_v0 }
  0x9b   :  { %v99_v24 = vmul.f32 %v98_v22, %v92_v12  ;;  %v101_v46 = vmul.f32 %v100_v26, %v95_v13  ;;  %v103_v52 = vmul.f32 %v98_v22, %v95_v13  ;;  %v215_v7 = vmul.f32 %v214_v27, %v208_v53 }
  0x9c   :  { %1882 = vst [vmem:[#allocation21_spill] sm:$0xff] %v1258_v19  ;;  %v219_v13 = vmul.f32 %v214_v27, %v211_v42  ;;  %v220_v37 = vmul.f32 %v216_v28, %v208_v53  ;;  %v1295_v35 = vadd.f32 %v354_v9, %v353_v54  ;;  %v1884_v54 = vstv %s1030_s13  ;;  %s1468_s13 = sld [smem:[#allocation2 + $0x23]] }
  0x9d   :  { %v1241_v63 = vpop.permute.xlu1 %108  ;;  %v102_v38 = vsub.f32 %v99_v24, %v101_v46 }
  0x9e   :  { %v116_v55 = vmul.f32 %v1058_v8, %v1241_v63  ;;  %v115_v61 = vpop.permute.xlu0 %114  ;;  %v104_v8 = vmul.f32 %v100_v26, %v92_v12  ;;  %v240_v25 = vmul.f32 %v1241_v63, %v1072_v14  ;;  %v1282_v18 = vmul.f32 %v1241_v63, %v1117_v45 }
  0x9f   :  { %v117_v49 = vmul.f32 %v115_v61, %v1104_v32  ;;  %v120_v20 = vmul.f32 %v115_v61, %v1241_v63  ;;  %v223_v22 = vmul.f32 %v115_v61, %v1032_v3  ;;  %v1287_v26 = vmul.f32 %v1153_v5, %v997_v1 }
  0xa0   :  { %v217_v12 = vmul.f32 %v216_v28, %v211_v42  ;;  %v105_v36 = vadd.f32 %v104_v8, %v103_v52  ;;  %v226_v33 = vmul.f32 %v115_v61, %v1016_v2  ;;  %v1298_v19 = vadd.f32 %v241_v21, %v240_v25 }
  0xa1   :  { %v118_v57 = vadd.f32 %v117_v49, %v116_v55  ;;  %v358_v44 = vmul.f32 %v1241_v63, %v1016_v2  ;;  %v1304_v27 = vmul.f32 %v1241_v63, %v1032_v3  ;;  %v121_v28 = vsub.f32 %v1126_v51, %v120_v20 }
  0xa2   :  { %v245_v53 = vsub.f32 %v1157_v6, %v1282_v18  ;;  %v1885_v55 = vstv %s1034_s14  ;;  %v224_v21 = vadd.f32 %v223_v22, %v1098_v30  ;;  %v218_v46 = vsub.f32 %v215_v7, %v217_v12  ;;  %s1485_s14 = sld [smem:[#allocation6 + $0x23]] }
  0xa3   :  { %1883 = vst [vmem:[#allocation22_spill] sm:$0xff] %v1304_v27  ;;  %v125_v42 = vmul.f32 %v1884_v54, %v118_v57  ;;  %v130_v9 = vmul.f32 %v1885_v55, %v118_v57  ;;  %v1886_v52 = vmov %v1885_v55  ;;  %v1887_v25 = vmov %v1884_v54 }
  0xa4   :  { %v127_v8 = vmul.f32 %v1886_v52, %v121_v28  ;;  %v129_v49 = vmul.f32 %v1887_v25, %v121_v28  ;;  %v221_v20 = vadd.f32 %v220_v37, %v219_v13  ;;  %v227_v58 = vsub.f32 %v1102_v31, %v226_v33 }
  0xa5   :  { %v1314_v24 = vpop.permute.xlu1 %154  ;;  %v1888_v54 = vstv %s1040_s19  ;;  %v325_v57 = vmul.f32 %v115_v61, %v1117_v45  ;;  %v1889_v30 = vstv %s1044_s21  ;;  %v1329_v7 = vadd.f32 %v1136_v56, %v358_v44  ;;  %s1519_s19 = sld [smem:[#allocation2 + $0xb]] }
  0xa6   :  { %v231_v10 = vmul.f32 %v1888_v54, %v224_v21  ;;  %v249_v22 = vmul.f32 %v1889_v30, %v1298_v19  ;;  %v363_v12 = vsub.f32 %v1167_v11, %v1304_v27  ;;  %v328_v37 = vmul.f32 %v115_v61, %v1072_v14  ;;  %v1334_v31 = vpop.permute.xlu0 %152 }
  0xa7   :  { %1890 = vst [vmem:[#allocation23_spill] sm:$0xff] %v1329_v7  ;;  %v1891_v33 = vstv %s1054_s22  ;;  %v128_v28 = vsub.f32 %v125_v42, %v127_v8  ;;  %v131_v55 = vadd.f32 %v130_v9, %v129_v49  ;;  %v1892_v52 = vstv %s1042_s20  ;;  %s1527_s20 = sld [smem:[#allocation6 + $0xb]] }
  0xa8   :  { %v251_v13 = vmul.f32 %v1891_v33, %v245_v53  ;;  %v233_v25 = vmul.f32 %v1892_v52, %v227_v58  ;;  %v106_v56 = vadd.f32 %v102_v38, %v78_v40  ;;  %v1893_v44 = vmov %v1888_v54  ;;  %s1549_s22 = sld [smem:[#allocation6 + $0xf]] }
  0xa9   :  { %v235_v54 = vmul.f32 %v1893_v44, %v227_v58  ;;  %v1894_v30 = vmov %v1892_v52  ;;  %v326_v27 = vadd.f32 %v325_v57, %v1173_v17  ;;  %v107_v61 = vadd.f32 %v105_v36, %v1236_v39 }
  0xaa   :  { %v236_v51 = vmul.f32 %v1894_v30, %v224_v21  ;;  %v1895_v11 = vmov %v1891_v33  ;;  %v234_v14 = vsub.f32 %v231_v10, %v233_v25  ;;  %v329_v42 = vsub.f32 %v1231_v48, %v328_v37 }
  0xab   :  { %v254_v45 = vmul.f32 %v1895_v11, %v1298_v19  ;;  %v1896_v9 = vstv %s1044_s21  ;;  %v1897_v38 = vstv %s1079_s28  ;;  %v1898_v58 = vstv %s1082_s29  ;;  %s1547_s21 = sld [smem:[#allocation2 + $0xf]] }
  0xac   :  { %v253_v8 = vmul.f32 %v1896_v9, %v245_v53  ;;  %v1355_v40 = vmul.f32 %v1897_v38, %v1329_v7  ;;  %v1359_v17 = vmul.f32 %v1898_v58, %v363_v12  ;;  %v1899_v36 = vmov %v1898_v58  ;;  %s1650_s28 = sld [smem:[#allocation2 + $0x13]] }
  0xad   :  { %v372_v39 = vmul.f32 %v1899_v36, %v1329_v7  ;;  %v252_v10 = vsub.f32 %v249_v22, %v251_v13  ;;  %v1900_v11 = vmov %v1897_v38  ;;  %v132_v21 = vadd.f32 %v128_v28, %v106_v56  ;;  %v1368_v53 = vpop.permute.xlu1 %617  ;;  %s1660_s29 = sld [smem:[#allocation6 + $0x13]] }
  0xae   :  { %v371_v48 = vmul.f32 %v1900_v11, %v363_v12  ;;  %v133_v49 = vadd.f32 %v131_v55, %v107_v61  ;;  %1901 = vst [vmem:[#allocation24_spill] sm:$0xff] %v1368_v53  ;;  %v237_v57 = vadd.f32 %v236_v51, %v235_v54  ;;  %v238_v37 = vadd.f32 %v234_v14, %v218_v46  ;;  %v1413_v36 = vpop.permute.xlu0 %176 }
  0xaf   :  { %v1902_v33 = vstv %s1064_s1  ;;  %v276_v25 = vmul.f32 %v1334_v31, %v1241_v63  ;;  %v1903_v44 = vstv %s1066_s2  ;;  %v277_v55 = vmul.f32 %v1314_v24, %v1104_v32  ;;  %s1591_s1 = sld [smem:[#allocation2 + $0x11]] }
  0xb0   :  { %v1372_v52 = vmul.f32 %v1902_v33, %v326_v27  ;;  %v1380_v30 = vmul.f32 %v1903_v44, %v329_v42  ;;  %v1904_v22 = vmov %v1902_v33  ;;  %v1905_v12 = vmov %v1903_v44  ;;  %s1600_s2 = sld [smem:[#allocation6 + $0x11]] }
  0xb1   :  { %v337_v13 = vmul.f32 %v1904_v22, %v329_v42  ;;  %v338_v28 = vmul.f32 %v1905_v12, %v326_v27  ;;  %v255_v14 = vadd.f32 %v254_v45, %v253_v8  ;;  %v701_v51 = vmul.f32 %v1368_v53, %v1334_v31 }
  0xb2   :  { %v704_v56 = vmul.f32 %v1368_v53, %v1314_v24  ;;  %v1396_v54 = vadd.f32 %v372_v39, %v371_v48  ;;  %v702_v27 = vmul.f32 %v1249_v41, %v1314_v24  ;;  %v279_v61 = vmul.f32 %v1314_v24, %v1241_v63 }
  0xb3   :  { %v280_v45 = vmul.f32 %v1334_v31, %v1104_v32  ;;  %v1906_v42 = vsub.f32 %v1202_v43, %v1206_v50  ;;  %v239_v8 = vadd.f32 %v237_v57, %v221_v20  ;;  %v256_v38 = vadd.f32 %v252_v10, %v238_v37 }
  0xb4   :  { %v705_v58 = vmul.f32 %v1249_v41, %v1334_v31  ;;  %v1418_v39 = vadd.f32 %v1243_v4, %v133_v49  ;;  %v1422_v50 = vadd.f32 %v338_v28, %v337_v13  ;;  %v1424_v43 = vadd.f32 %v277_v55, %v276_v25 }
  0xb5   :  { %v1409_v9 = vadd.f32 %v1906_v42, %v132_v21  ;;  %v703_v20 = vadd.f32 %v702_v27, %v701_v51  ;;  %v651_v48 = vsub.f32 %v1282_v18, %v1157_v6  ;;  %v656_v21 = vstv %s1364_s6  ;;  %v722_v42 = vpop.permute.xlu1 %721  ;;  %s1695_s6 = sld [smem:[#allocation6 + $0x15]] }
  0xb6   :  { %v706_v10 = vsub.f32 %v704_v56, %v705_v58  ;;  %v1431_v4 = vmul.f32 %v1368_v53, %v1153_v5  ;;  %v295_v49 = vmul.f32 %v1413_v36, %v997_v1  ;;  %v297_v57 = vmul.f32 %v1413_v36, %v992_v0 }
  0xb7   :  { %v675_v37 = vsub.f32 %v280_v45, %v279_v61  ;;  %v257_v33 = vadd.f32 %v255_v14, %v239_v8  ;;  %v1908_v25 = vsub.f32 %v1075_v15, %v1077_v16  ;;  %v1909_v6 = vstv %s1260_s5  ;;  %s1693_s5 = sld [smem:[#allocation2 + $0x15]] }
  0xb8   :  { %1907 = vst [vmem:[#allocation25_spill] sm:$0xff] %v1431_v4  ;;  %v655_v18 = vmul.f32 %v1909_v6, %v1298_v19  ;;  %v660_v22 = vmul.f32 %v656_v21, %v1298_v19  ;;  %v657_v13 = vmul.f32 %v656_v21, %v651_v48  ;;  %v1910_v12 = vmov %v1909_v6 }
  0xb9   :  { %v1440_v44 = vadd.f32 %v1908_v25, %v256_v38  ;;  %v659_v28 = vmul.f32 %v1910_v12, %v651_v48  ;;  %v678_v55 = vstv %s1376_s7  ;;  %v680_v51 = vstv %s1388_s8  ;;  %s1706_s7 = sld [smem:[#allocation2 + $0x16]] }
  0xba   :  { %v1911_v14 = vstv %s1169_s30  ;;  %v1912_v16 = vstv %s1175_s4  ;;  %v679_v27 = vmul.f32 %v678_v55, %v1424_v43  ;;  %v681_v19 = vmul.f32 %v680_v51, %v675_v37  ;;  %s1689_s4 = sld [smem:[#allocation6 + $0x14]] }
  0xbb   :  { %v1454_v15 = vmul.f32 %v1911_v14, %v703_v20  ;;  %v1458_v56 = vmul.f32 %v1912_v16, %v706_v10  ;;  %v1464_v8 = vadd.f32 %v295_v49, %v1276_v62  ;;  %v683_v38 = vmul.f32 %v678_v55, %v675_v37  ;;  %s1715_s8 = sld [smem:[#allocation6 + $0x16]] }
  0xbc   :  { %v684_v58 = vmul.f32 %v680_v51, %v1424_v43  ;;  %v688_v48 = vsub.f32 %v1287_v26, %v297_v57  ;;  %v1471_v21 = vadd.f32 %v1107_v34, %v257_v33  ;;  %v1913_v25 = vmov %v1912_v16 }
  0xbd   :  { %v1475_v6 = vmul.f32 %v1913_v25, %v703_v20  ;;  %v691_v12 = vstv %s1404_s9  ;;  %v693_v14 = vstv %s1415_s10  ;;  %v1914_v16 = vstv %s1169_s30  ;;  %s1680_s30 = sld [smem:[#allocation2 + $0x14]] }
  0xbe   :  { %v1481_v46 = vmul.f32 %v1914_v16, %v706_v10  ;;  %v1483_v62 = vsub.f32 %v279_v61, %v280_v45  ;;  %v658_v49 = vsub.f32 %v655_v18, %v657_v13  ;;  %v661_v37 = vadd.f32 %v660_v22, %v659_v28  ;;  %v720_v18 = vpop.permute.xlu0 %719  ;;  %s1728_s9 = sld [smem:[#allocation2 + $0x17]] }
  0xbf   :  { %v724_v34 = vmul.f32 %v722_v42, %v1413_v36  ;;  %v727_v33 = vmul.f32 %v722_v42, %v1153_v5  ;;  %v682_v20 = vsub.f32 %v679_v27, %v681_v19  ;;  %v685_v51 = vadd.f32 %v684_v58, %v683_v38  ;;  %s1732_s10 = sld [smem:[#allocation6 + $0x17]] }
  0xc0   :  { %v692_v10 = vmul.f32 %v691_v12, %v1464_v8  ;;  %v694_v61 = vmul.f32 %v693_v14, %v688_v48  ;;  %v696_v45 = vmul.f32 %v691_v12, %v688_v48  ;;  %v697_v22 = vmul.f32 %v693_v14, %v1464_v8 }
  0xc1   :  { %v156_v13 = vmul.f32 %v1334_v31, %v1016_v2  ;;  %v157_v28 = vmul.f32 %v1314_v24, %v1032_v3  ;;  %v159_v27 = vmul.f32 %v1314_v24, %v1016_v2  ;;  %v299_v19 = vsub.f32 %v297_v57, %v1287_v26 }
  0xc2   :  { %v1915_v42 = vsub.f32 %v1145_v59, %v1147_v60  ;;  %v674_v58 = vadd.f32 %v1227_v23, %v661_v37  ;;  %v160_v48 = vmul.f32 %v1334_v31, %v1032_v3  ;;  %v723_v25 = vmul.f32 %v720_v18, %v1153_v5 }
  0xc3   :  { %v158_v12 = vadd.f32 %v157_v28, %v156_v13  ;;  %v164_v14 = vstv %s1450_s11  ;;  %v166_v16 = vstv %s1461_s12  ;;  %v695_v4 = vsub.f32 %v692_v10, %v694_v61  ;;  %s1741_s11 = sld [smem:[#allocation2 + $0x18]] }
  0xc4   :  { %v673_v38 = vadd.f32 %v1915_v42, %v658_v49  ;;  %v687_v11 = vadd.f32 %v685_v51, %v674_v58  ;;  %v731_v26 = vstv %s1468_s13  ;;  %v698_v59 = vadd.f32 %v697_v22, %v696_v45  ;;  %s1743_s12 = sld [smem:[#allocation6 + $0x18]] }
  0xc5   :  { %v726_v60 = vmul.f32 %v720_v18, %v1413_v36  ;;  %v161_v23 = vsub.f32 %v159_v27, %v160_v48  ;;  %v165_v57 = vmul.f32 %v164_v14, %v158_v12  ;;  %v170_v49 = vmul.f32 %v166_v16, %v158_v12  ;;  %s1748_s13 = sld [smem:[#allocation2 + $0x19]] }
  0xc6   :  { %v686_v55 = vadd.f32 %v682_v20, %v673_v38  ;;  %v178_v37 = vmul.f32 %v1153_v5, %v1241_v63  ;;  %v179_v20 = vmul.f32 %v1413_v36, %v1104_v32  ;;  %v181_v51 = vmul.f32 %v1413_v36, %v1241_v63 }
  0xc7   :  { %v725_v10 = vadd.f32 %v724_v34, %v723_v25  ;;  %v167_v61 = vmul.f32 %v166_v16, %v161_v23  ;;  %v169_v45 = vmul.f32 %v164_v14, %v161_v23  ;;  %v182_v18 = vmul.f32 %v1153_v5, %v1104_v32 }
  0xc8   :  { %v733_v22 = vstv %s1485_s14  ;;  %v180_v13 = vadd.f32 %v179_v20, %v178_v37  ;;  %v186_v28 = vstv %s1491_s15  ;;  %v188_v27 = vstv %s1494_s16  ;;  %s1754_s14 = sld [smem:[#allocation6 + $0x19]] }
  0xc9   :  { %v699_v42 = vadd.f32 %v695_v4, %v686_v55  ;;  %v700_v38 = vadd.f32 %v698_v59, %v687_v11  ;;  %v168_v58 = vsub.f32 %v165_v57, %v167_v61  ;;  %v183_v48 = vsub.f32 %v181_v51, %v182_v18  ;;  %s1757_s15 = sld [smem:[#allocation2 + $0x1a]] }
  0xca   :  { %v171_v12 = vadd.f32 %v170_v49, %v169_v45  ;;  %v187_v53 = vmul.f32 %v186_v28, %v180_v13  ;;  %v192_v41 = vmul.f32 %v188_v27, %v180_v13  ;;  %v284_v7 = vstv %s1510_s17  ;;  %s1761_s16 = sld [smem:[#allocation6 + $0x1a]] }
  0xcb   :  { %v728_v34 = vsub.f32 %v726_v60, %v727_v33  ;;  %v1535_v25 = vmul.f32 %v731_v26, %v725_v10  ;;  %v172_v14 = vadd.f32 %v168_v58, %v1409_v9  ;;  %v189_v16 = vmul.f32 %v188_v27, %v183_v48  ;;  %s1772_s17 = sld [smem:[#allocation2 + $0x1b]] }
  0xcc   :  { %v191_v23 = vmul.f32 %v186_v28, %v183_v48  ;;  %v285_v37 = vmul.f32 %v284_v7, %v1424_v43  ;;  %v286_v20 = vstv %s1516_s18  ;;  %v289_v11 = vmul.f32 %v284_v7, %v1483_v62  ;;  %s1776_s18 = sld [smem:[#allocation6 + $0x1b]] }
  0xcd   :  { %v190_v4 = vsub.f32 %v187_v53, %v189_v16  ;;  %v287_v55 = vmul.f32 %v286_v20, %v1483_v62  ;;  %v290_v59 = vmul.f32 %v286_v20, %v1424_v43  ;;  %v302_v57 = vstv %s1519_s19  ;;  %s1782_s19 = sld [smem:[#allocation2 + $0x1c]] }
  0xce   :  { %v173_v49 = vadd.f32 %v171_v12, %v1418_v39  ;;  %v193_v33 = vadd.f32 %v192_v41, %v191_v23  ;;  %v303_v60 = vmul.f32 %v302_v57, %v1464_v8  ;;  %v304_v51 = vstv %s1527_s20  ;;  %s1788_s20 = sld [smem:[#allocation6 + $0x1c]] }
  0xcf   :  { %v194_v9 = vadd.f32 %v190_v4, %v172_v14  ;;  %v288_v61 = vsub.f32 %v285_v37, %v287_v55  ;;  %v305_v45 = vmul.f32 %v304_v51, %v299_v19  ;;  %v307_v18 = vmul.f32 %v302_v57, %v299_v19  ;;  %v1919_v4 = vld [vmem:[#allocation14_spill] sm:$0xff] }
  0xd0   :  { %v734_v7 = vmul.f32 %v733_v22, %v728_v34  ;;  %v736_v53 = vmul.f32 %v731_v26, %v728_v34  ;;  %v195_v62 = vadd.f32 %v193_v33, %v173_v49  ;;  %v308_v43 = vmul.f32 %v304_v51, %v1464_v8 }
  0xd1   :  { %v196_v13 = vrot.slane %v194_v9, 4  ;;  %v291_v28 = vadd.f32 %v290_v59, %v289_v11  ;;  %v292_v41 = vadd.f32 %v288_v61, %v1440_v44  ;;  %v306_v39 = vsub.f32 %v303_v60, %v305_v45 }
  0xd2   :  { %v737_v27 = vmul.f32 %v733_v22, %v725_v10  ;;  %v198_v58 = vrot.slane %v195_v62, 4  ;;  %v376_v48 = vmul.f32 %v1241_v63, %v992_v0  ;;  %v377_v19 = vmul.f32 %v1104_v32, %v997_v1 }
  0xd3   :  { %v716_v12 = vadd.f32 %v1475_v6, %v1481_v46  ;;  %v197_v26 = vadd.f32 %v196_v13, %v194_v9  ;;  %v309_v34 = vadd.f32 %v308_v43, %v307_v18  ;;  %v310_v8 = vadd.f32 %v306_v39, %v292_v41 }
  0xd4   :  { %v1916_v14 = vsub.f32 %v1372_v52, %v1380_v30  ;;  %v1917_v44 = vsub.f32 %v1217_v29, %v1221_v47  ;;  %v199_v22 = vadd.f32 %v198_v58, %v195_v62  ;;  %v1567_v16 = vmul.f32 %v1241_v63, %v997_v1 }
  0xd5   :  { %v1571_v46 = vmul.f32 %v1104_v32, %v992_v0  ;;  %v357_v6 = vadd.f32 %v1295_v35, %v1422_v50  ;;  %v1918_v52 = vsub.f32 %v1454_v15, %v1458_v56  ;;  %v718_v23 = vadd.f32 %v716_v12, %v700_v38  ;;  %v1920_v56 = vld [vmem:[#allocation15_spill] sm:$0xff] }
  0xd6   :  { %v356_v10 = vadd.f32 %v1917_v44, %v1916_v14  ;;  %v293_v29 = vadd.f32 %v291_v28, %v1471_v21  ;;  %v735_v47 = vsub.f32 %v1535_v25, %v734_v7  ;;  %v738_v37 = vadd.f32 %v737_v27, %v736_v53 }
  0xd7   :  { %v717_v30 = vadd.f32 %v1918_v52, %v699_v42  ;;  %v1582_v20 = vadd.f32 %v377_v19, %v376_v48  ;;  %v384_v11 = vstv %s1547_s21  ;;  %v1588_v55 = vmul.f32 %v197_v26, %v1919_v4  ;;  %s1796_s21 = sld [smem:[#allocation2 + $0x1d]] }
  0xd8   :  { %v311_v35 = vadd.f32 %v309_v34, %v293_v29  ;;  %v312_v50 = vrot.slane %v310_v8, 4  ;;  %v386_v15 = vstv %s1549_s22  ;;  %v1594_v21 = vmul.f32 %v199_v22, %v1920_v56  ;;  %s1802_s22 = sld [smem:[#allocation6 + $0x1d]] }
  0xd9   :  { %v203_v42 = vmul.f32 %v197_v26, %v1920_v56  ;;  %v204_v38 = vmul.f32 %v199_v22, %v1919_v4  ;;  %v381_v25 = vsub.f32 %v1567_v16, %v1571_v46  ;;  %v1921_v59 = vsub.f32 %v1355_v40, %v1359_v17 }
  0xda   :  { %v375_v49 = vadd.f32 %v1396_v54, %v357_v6  ;;  %v394_v33 = vmul.f32 %v1334_v31, %v992_v0  ;;  %v395_v60 = vmul.f32 %v1314_v24, %v997_v1  ;;  %v1610_v51 = vadd.f32 %v735_v47, %v717_v30 }
  0xdb   :  { %v374_v57 = vadd.f32 %v1921_v59, %v356_v10  ;;  %v1612_v9 = vadd.f32 %v738_v37, %v718_v23  ;;  %v385_v61 = vmul.f32 %v384_v11, %v1582_v20  ;;  %v1617_v45 = vmul.f32 %v1314_v24, %v992_v0 }
  0xdc   :  { %v313_v40 = vadd.f32 %v312_v50, %v310_v8  ;;  %v314_v17 = vrot.slane %v311_v35, 4  ;;  %v390_v54 = vmul.f32 %v386_v15, %v1582_v20  ;;  %v1622_v18 = vmul.f32 %v1334_v31, %v997_v1 }
  0xdd   :  { %v202_v7 = vsub.f32 %v1588_v55, %v1594_v21  ;;  %v1626_v53 = vadd.f32 %v204_v38, %v203_v42  ;;  %v387_v62 = vmul.f32 %v386_v15, %v381_v25  ;;  %v389_v43 = vmul.f32 %v384_v11, %v381_v25 }
  0xde   :  { %v1630_v0 = vadd.f32 %v395_v60, %v394_v33  ;;  %v402_v13 = vstv %s1579_s23  ;;  %v412_v28 = vmul.f32 %v1153_v5, %v1334_v31  ;;  %v413_v1 = vmul.f32 %v1413_v36, %v1314_v24  ;;  %s959_s23 = smov [#allocation9]  }
  0xdf   :  { %v399_v41 = vsub.f32 %v1617_v45, %v1622_v18  ;;  %v404_v39 = vstv %s1585_s24  ;;  %v1644_v27 = vmul.f32 %v1413_v36, %v1334_v31  ;;  %v1648_v58 = vmul.f32 %v1153_v5, %v1314_v24  ;;  %s759_s24 = sshll.u32 %s959_s23, 4  ;;  %s760_s24 = int_to_ptr.vmem [resolvable:$true] %s759_s24 }
  0xe0   :  { %v315_v48 = vadd.f32 %v314_v17, %v311_v35  ;;  %v1653_v19 = vmul.f32 %v313_v40, %v1016_v2  ;;  %v1656_v12 = vmul.f32 %v313_v40, %v1032_v3  ;;  %v1658_v26 = vadd.f32 %v413_v1, %v412_v28 }
  0xe1   :  { %v417_v34 = vsub.f32 %v1644_v27, %v1648_v58  ;;  %v420_v8 = vstv %s1591_s1  ;;  %v422_v14 = vstv %s1600_s2  ;;  %v443_v44 = vmul.f32 %v1920_v56, %v1920_v56 }
  0xe2   :  { %v388_v10 = vsub.f32 %v385_v61, %v387_v62  ;;  %v391_v22 = vadd.f32 %v390_v54, %v389_v43  ;;  %v403_v6 = vmul.f32 %v402_v13, %v1630_v0  ;;  %v408_v52 = vmul.f32 %v404_v39, %v1630_v0 }
  0xe3   :  { %v405_v30 = vmul.f32 %v404_v39, %v399_v41  ;;  %v407_v23 = vmul.f32 %v402_v13, %v399_v41  ;;  %v442_v29 = vmul.f32 %v1919_v4, %v1919_v4  ;;  %v445_v47 = vmul.f32 %v1920_v56, %v1919_v4 }
  0xe4   :  { %v1675_v37 = vmul.f32 %v315_v48, %v1032_v3  ;;  %v421_v11 = vmul.f32 %v420_v8, %v1658_v26  ;;  %v423_v35 = vmul.f32 %v422_v14, %v417_v34  ;;  %v426_v50 = vmul.f32 %v422_v14, %v1658_v26 }
  0xe5   :  { %v425_v15 = vmul.f32 %v420_v8, %v417_v34  ;;  %v444_v42 = vadd.f32 %v443_v44, %v442_v29  ;;  %v446_v38 = vsub.f32 %v445_v47, %v445_v47  ;;  %v449_v25 = vstv %s1628_s26  ;;  %s761_s26 = sshll.u32 %s1860_s3, 4  ;;  %s762_s26 = int_to_ptr.hbm [resolvable:$true] %s761_s26 }
  0xe6   :  { %v451_v59 = vstv %s1637_s27  ;;  %v457_v4 = vmul.f32 %v1016_v2, %v1016_v2  ;;  %v458_v56 = vmul.f32 %v1032_v3, %v1032_v3  ;;  %v460_v33 = vmul.f32 %v1032_v3, %v1016_v2 }
  0xe7   :  { %v392_v60 = vadd.f32 %v388_v10, %v374_v57  ;;  %v393_v61 = vadd.f32 %v391_v22, %v375_v49  ;;  %v406_v40 = vsub.f32 %v403_v6, %v405_v30  ;;  %v409_v17 = vadd.f32 %v408_v52, %v407_v23 }
  0xe8   :  { %v459_v54 = vadd.f32 %v458_v56, %v457_v4  ;;  %v461_v62 = vsub.f32 %v460_v33, %v460_v33  ;;  %v464_v43 = vstv %s1650_s28  ;;  %v466_v13 = vstv %s1660_s29 }
  0xe9   :  { %v450_v28 = vmul.f32 %v449_v25, %v444_v42  ;;  %v452_v1 = vmul.f32 %v451_v59, %v446_v38  ;;  %v454_v41 = vmul.f32 %v449_v25, %v446_v38  ;;  %v455_v39 = vmul.f32 %v451_v59, %v444_v42  ;;  %v1718_v25 = vld [vmem:[#allocation8] sm:$0xff] }
  0xea   :  { %v424_v34 = vsub.f32 %v421_v11, %v423_v35  ;;  %v427_v8 = vadd.f32 %v426_v50, %v425_v15  ;;  %v465_v3 = vmul.f32 %v464_v43, %v459_v54  ;;  %v467_v57 = vmul.f32 %v466_v13, %v461_v62 }
  0xeb   :  { %v469_v49 = vmul.f32 %v464_v43, %v461_v62  ;;  %v470_v14 = vmul.f32 %v466_v13, %v459_v54  ;;  %v474_v44 = vmul.f32 %v1241_v63, %v1241_v63  ;;  %v475_v10 = vmul.f32 %v1104_v32, %v1104_v32 }
  0xec   :  { %v1702_v22 = vmul.f32 %v315_v48, %v1016_v2  ;;  %v410_v6 = vadd.f32 %v406_v40, %v392_v60  ;;  %v411_v52 = vadd.f32 %v409_v17, %v393_v61  ;;  %v477_v30 = vmul.f32 %v1104_v32, %v1241_v63  ;;  %v1722_v17 = vld [vmem:[#allocation8 + $0x8] sm:$0xff] }
  0xed   :  { %v318_v23 = vsub.f32 %v1653_v19, %v1675_v37  ;;  %v453_v29 = vsub.f32 %v450_v28, %v452_v1  ;;  %v456_v47 = vadd.f32 %v455_v39, %v454_v41  ;;  %v481_v11 = vstv %s1680_s30 }
  0xee   :  { %v1711_v35 = vadd.f32 %v424_v34, %v410_v6  ;;  %v1713_v50 = vadd.f32 %v427_v8, %v411_v52  ;;  %v476_v2 = vadd.f32 %v475_v10, %v474_v44  ;;  %v478_v48 = vsub.f32 %v477_v30, %v477_v30 }
  0xef   :  { %v468_v15 = vsub.f32 %v465_v3, %v467_v57  ;;  %v471_v42 = vadd.f32 %v470_v14, %v469_v49  ;;  %v483_v38 = vstv %s1689_s4  ;;  %v491_v59 = vmul.f32 %v1718_v25, %v1718_v25 }
  0xf0   :  { %v482_v4 = vmul.f32 %v481_v11, %v476_v2  ;;  %v484_v56 = vmul.f32 %v483_v38, %v478_v48  ;;  %v486_v33 = vmul.f32 %v481_v11, %v478_v48  ;;  %v487_v60 = vmul.f32 %v483_v38, %v476_v2 }
  0xf1   :  { %v472_v61 = vadd.f32 %v468_v15, %v453_v29  ;;  %v473_v40 = vadd.f32 %v471_v42, %v456_v47  ;;  %v492_v54 = vmul.f32 %v1722_v17, %v1722_v17  ;;  %v494_v62 = vmul.f32 %v1722_v17, %v1718_v25 }
  0xf2   :  { %v485_v43 = vsub.f32 %v482_v4, %v484_v56  ;;  %v488_v13 = vadd.f32 %v487_v60, %v486_v33  ;;  %v498_v28 = vstv %s1693_s5  ;;  %v500_v1 = vstv %s1695_s6 }
  0xf3   :  { %v493_v41 = vadd.f32 %v492_v54, %v491_v59  ;;  %v495_v39 = vsub.f32 %v494_v62, %v494_v62  ;;  %v508_v34 = vmul.f32 %v1334_v31, %v1334_v31  ;;  %v509_v8 = vmul.f32 %v1314_v24, %v1314_v24 }
  0xf4   :  { %v489_v3 = vadd.f32 %v485_v43, %v472_v61  ;;  %v490_v57 = vadd.f32 %v488_v13, %v473_v40  ;;  %v511_v49 = vmul.f32 %v1314_v24, %v1334_v31  ;;  %v515_v14 = vstv %s1706_s7 }
  0xf5   :  { %v499_v44 = vmul.f32 %v498_v28, %v493_v41  ;;  %v501_v10 = vmul.f32 %v500_v1, %v495_v39  ;;  %v503_v6 = vmul.f32 %v498_v28, %v495_v39  ;;  %v504_v52 = vmul.f32 %v500_v1, %v493_v41 }
  0xf6   :  { %v510_v30 = vadd.f32 %v509_v8, %v508_v34  ;;  %v512_v29 = vsub.f32 %v511_v49, %v511_v49  ;;  %v517_v47 = vstv %s1715_s8  ;;  %v525_v11 = vmul.f32 %v1153_v5, %v1153_v5  ;;  %v1923_v49 = vld [vmem:[#allocation16_spill] sm:$0xff] }
  0xf7   :  { %v502_v2 = vsub.f32 %v499_v44, %v501_v10  ;;  %v505_v48 = vadd.f32 %v504_v52, %v503_v6  ;;  %v526_v15 = vmul.f32 %v1413_v36, %v1413_v36  ;;  %v528_v42 = vmul.f32 %v1413_v36, %v1153_v5 }
  0xf8   :  { %v516_v38 = vmul.f32 %v515_v14, %v510_v30  ;;  %v518_v59 = vmul.f32 %v517_v47, %v512_v29  ;;  %v520_v4 = vmul.f32 %v515_v14, %v512_v29  ;;  %v521_v56 = vmul.f32 %v517_v47, %v510_v30 }
  0xf9   :  { %v430_v33 = vrot.slane %v1711_v35, 4  ;;  %v506_v60 = vadd.f32 %v502_v2, %v489_v3  ;;  %v527_v61 = vadd.f32 %v526_v15, %v525_v11  ;;  %v529_v40 = vsub.f32 %v528_v42, %v528_v42  ;;  %v1922_v3 = vld [vmem:[#allocation17_spill] sm:$0xff]  ;;  %v1924_v11 = vld [vmem:[#allocation19_spill] sm:$0xff]  ;;  %v1925_v15 = vld [vmem:[#allocation18_spill] sm:$0xff] }
  0xfa   :  { %v519_v54 = vsub.f32 %v516_v38, %v518_v59  ;;  %v522_v62 = vadd.f32 %v521_v56, %v520_v4  ;;  %v532_v43 = vstv %s1728_s9  ;;  %v534_v13 = vstv %s1732_s10  ;;  %v1926_v42 = vld [vmem:[#allocation22_spill] sm:$0xff] }
  0xfb   :  { %v533_v28 = vmul.f32 %v532_v43, %v527_v61  ;;  %v535_v1 = vmul.f32 %v534_v13, %v529_v40  ;;  %v537_v41 = vmul.f32 %v532_v43, %v529_v40  ;;  %v538_v39 = vmul.f32 %v534_v13, %v527_v61 }
  0xfc   :  { %v432_v34 = vrot.slane %v1713_v50, 4  ;;  %v507_v8 = vadd.f32 %v505_v48, %v490_v57  ;;  %v554_v14 = vsub.f32 %v1923_v49, %v1922_v3  ;;  %v557_v44 = vstv %s1741_s11 }
  0xfd   :  { %v523_v10 = vadd.f32 %v519_v54, %v506_v60  ;;  %v536_v6 = vsub.f32 %v533_v28, %v535_v1  ;;  %v539_v52 = vadd.f32 %v538_v39, %v537_v41  ;;  %v559_v30 = vstv %s1743_s12 }
  0xfe   :  { %v431_v29 = vadd.f32 %v430_v33, %v1711_v35  ;;  %v524_v47 = vadd.f32 %v522_v62, %v507_v8  ;;  %v558_v2 = vmul.f32 %v557_v44, %v1924_v11  ;;  %v565_v38 = vsub.f32 %v1926_v42, %v1925_v15  ;;  %v1927_v35 = vld [vmem:[#allocation23_spill] sm:$0xff] }
  0xff   :  { %v540_v59 = vadd.f32 %v536_v6, %v523_v10  ;;  %v560_v57 = vmul.f32 %v559_v30, %v554_v14  ;;  %v568_v48 = vstv %s1748_s13  ;;  %v570_v4 = vstv %s1754_s14 }
 0x100   :  { %v433_v56 = vadd.f32 %v432_v34, %v1713_v50  ;;  %v541_v60 = vadd.f32 %v539_v52, %v524_v47  ;;  %v569_v33 = vmul.f32 %v568_v48, %v1927_v35  ;;  %v571_v61 = vmul.f32 %v570_v4, %v565_v38 }
 0x101   :  { %v562_v40 = vmul.f32 %v557_v44, %v554_v14  ;;  %v563_v54 = vmul.f32 %v559_v30, %v1924_v11  ;;  %v573_v62 = vmul.f32 %v568_v48, %v565_v38  ;;  %v574_v43 = vmul.f32 %v570_v4, %v1927_v35 }
 0x102   :  { %v572_v13 = vsub.f32 %v569_v33, %v571_v61  ;;  %v578_v28 = vsub.f32 %v1571_v46, %v1567_v16  ;;  %v581_v1 = vstv %s1757_s15  ;;  %v583_v41 = vstv %s1761_s16  ;;  %v1928_v33 = vld [vmem:[#allocation20_spill] sm:$0xff] }
 0x103   :  { %v321_v50 = vadd.f32 %v1702_v22, %v1656_v12  ;;  %v542_v39 = vrot.slane %v540_v59, 4  ;;  %v561_v34 = vsub.f32 %v558_v2, %v560_v57  ;;  %v582_v8 = vmul.f32 %v581_v1, %v1582_v20 }
 0x104   :  { %v1794_v3 = vmul.f32 %v431_v29, %v1241_v63  ;;  %v544_v49 = vrot.slane %v541_v60, 4  ;;  %v575_v14 = vadd.f32 %v574_v43, %v573_v62  ;;  %v584_v44 = vmul.f32 %v583_v41, %v578_v28 }
 0x105   :  { %v1799_v16 = vmul.f32 %v433_v56, %v1104_v32  ;;  %v576_v46 = vadd.f32 %v572_v13, %v561_v34  ;;  %v586_v10 = vmul.f32 %v581_v1, %v578_v28  ;;  %v587_v12 = vmul.f32 %v583_v41, %v1582_v20  ;;  %v1930_v28 = vld [vmem:[#allocation25_spill] sm:$0xff] }
 0x106   :  { %v437_v22 = vmul.f32 %v431_v29, %v1104_v32  ;;  %v438_v6 = vmul.f32 %v433_v56, %v1241_v63  ;;  %v564_v52 = vadd.f32 %v563_v54, %v562_v40  ;;  %v591_v30 = vsub.f32 %v1622_v18, %v1617_v45 }
 0x107   :  { %v543_v47 = vadd.f32 %v542_v39, %v540_v59  ;;  %v585_v11 = vsub.f32 %v582_v8, %v584_v44  ;;  %v594_v2 = vstv %s1772_s17  ;;  %v596_v15 = vstv %s1776_s18  ;;  %v1931_v8 = vld [vmem:[#allocation21_spill] sm:$0xff] }
 0x108   :  { %v545_v42 = vadd.f32 %v544_v49, %v541_v60  ;;  %v577_v38 = vadd.f32 %v575_v14, %v564_v52  ;;  %v595_v20 = vmul.f32 %v594_v2, %v1630_v0  ;;  %v597_v57 = vmul.f32 %v596_v15, %v591_v30 }
 0x109   :  { %v588_v48 = vadd.f32 %v587_v12, %v586_v10  ;;  %v589_v4 = vadd.f32 %v585_v11, %v576_v46  ;;  %v599_v32 = vmul.f32 %v594_v2, %v591_v30  ;;  %v600_v63 = vmul.f32 %v596_v15, %v1630_v0  ;;  %v1929_v0 = vld [vmem:[#allocation24_spill] sm:$0xff] }
 0x10a   :  { %v598_v29 = vsub.f32 %v595_v20, %v597_v57  ;;  %v604_v45 = vsub.f32 %v1648_v58, %v1644_v27  ;;  %v607_v18 = vstv %s1782_s19  ;;  %v609_v59 = vstv %s1788_s20 }
 0x10b   :  { %v601_v56 = vadd.f32 %v600_v63, %v599_v32  ;;  %v608_v60 = vmul.f32 %v607_v18, %v1658_v26  ;;  %v613_v35 = vmul.f32 %v609_v59, %v1658_v26  ;;  %v622_v61 = vmul.f32 %v1928_v33, %v1413_v36 }
 0x10c   :  { %v590_v40 = vadd.f32 %v588_v48, %v577_v38  ;;  %v610_v54 = vmul.f32 %v609_v59, %v604_v45  ;;  %v612_v62 = vmul.f32 %v607_v18, %v604_v45  ;;  %v624_v43 = vmul.f32 %v1929_v0, %v1413_v36 }
 0x10d   :  { %v602_v13 = vadd.f32 %v598_v29, %v589_v4  ;;  %v623_v1 = vadd.f32 %v622_v61, %v1930_v28  ;;  %v629_v27 = vstv %s1796_s21  ;;  %v631_v58 = vstv %s1802_s22 }
 0x10e   :  { %v603_v41 = vadd.f32 %v601_v56, %v590_v40  ;;  %v611_v39 = vsub.f32 %v608_v60, %v610_v54  ;;  %v614_v34 = vadd.f32 %v613_v35, %v612_v62  ;;  %v626_v49 = vsub.f32 %v624_v43, %v1931_v8 }
 0x10f   :  { %v741_v26 = vrot.slane %v1610_v51, 4  ;;  %v743_v14 = vrot.slane %v1612_v9, 4  ;;  %v630_v44 = vmul.f32 %v629_v27, %v623_v1  ;;  %v635_v46 = vmul.f32 %v631_v58, %v623_v1 }
 0x110   :  { %v615_v10 = vadd.f32 %v611_v39, %v602_v13  ;;  %v616_v12 = vadd.f32 %v614_v34, %v603_v41  ;;  %v632_v52 = vmul.f32 %v631_v58, %v626_v49  ;;  %v634_v30 = vmul.f32 %v629_v27, %v626_v49 }
 0x111   :  { %v322_v11 = vadd.f32 %v318_v23, %v202_v7  ;;  %v323_v2 = vadd.f32 %v321_v50, %v1626_v53  ;;  %v436_v15 = vsub.f32 %v1794_v3, %v1799_v16  ;;  %v439_v38 = vadd.f32 %v438_v6, %v437_v22 }
 0x112   :  { %v546_v20 = vmul.f32 %v1718_v25, %v543_v47  ;;  %v547_v57 = vmul.f32 %v1722_v17, %v545_v42  ;;  %v633_v48 = vsub.f32 %v630_v44, %v632_v52  ;;  %v636_v4 = vadd.f32 %v635_v46, %v634_v30 }
 0x113   :  { %v549_v32 = vmul.f32 %v1722_v17, %v543_v47  ;;  %v550_v55 = vmul.f32 %v1718_v25, %v545_v42  ;;  %v742_v21 = vadd.f32 %v741_v26, %v1610_v51  ;;  %v744_v7 = vadd.f32 %v743_v14, %v1612_v9 }
 0x114   :  { %v637_v19 = vadd.f32 %v633_v48, %v615_v10  ;;  %v638_v53 = vadd.f32 %v636_v4, %v616_v12  ;;  %v440_v37 = vadd.f32 %v436_v15, %v322_v11  ;;  %v441_v23 = vadd.f32 %v439_v38, %v323_v2 }
 0x115   :  { %v548_v16 = vsub.f32 %v546_v20, %v547_v57  ;;  %v551_v22 = vadd.f32 %v550_v55, %v549_v32  ;;  %v745_v6 = vmul.f32 %v742_v21, %v1153_v5  ;;  %v746_v63 = vmul.f32 %v744_v7, %v1413_v36 }
 0x116   :  { %v639_v50 = vrot.slane %v637_v19, 4  ;;  %v641_v3 = vrot.slane %v638_v53, 4  ;;  %v748_v25 = vmul.f32 %v742_v21, %v1413_v36  ;;  %v749_v51 = vmul.f32 %v744_v7, %v1153_v5 }
 0x117   :  { %v552_v47 = vadd.f32 %v548_v16, %v440_v37  ;;  %v553_v9 = vadd.f32 %v551_v22, %v441_v23  ;;  %v747_v35 = vsub.f32 %v745_v6, %v746_v63 }
 0x118   :  { %v640_v29 = vadd.f32 %v639_v50, %v637_v19  ;;  %v642_v17 = vadd.f32 %v641_v3, %v638_v53  ;;  %v750_v33 = vadd.f32 %v749_v51, %v748_v25 }
 0x11a   :  { %v643_v42 = vmul.f32 %v640_v29, %v1334_v31  ;;  %v644_v45 = vmul.f32 %v642_v17, %v1314_v24  ;;  %v646_v18 = vmul.f32 %v640_v29, %v1314_v24  ;;  %v647_v59 = vmul.f32 %v642_v17, %v1334_v31 }
 0x11c   :  { %v645_v56 = vsub.f32 %v643_v42, %v644_v45  ;;  %v648_v60 = vadd.f32 %v647_v59, %v646_v18 }
 0x11e   :  { %v649_v61 = vadd.f32 %v645_v56, %v552_v47  ;;  %v650_v40 = vadd.f32 %v648_v60, %v553_v9 }
 0x120   :  { %v751_v5 = vadd.f32 %v747_v35, %v649_v61  ;;  %v752_v36 = vadd.f32 %v750_v33, %v650_v40 }
 0x122   :  { %753 = vst [vmem:[#allocation9] sm:$0xff] %v751_v5 }
 0x123   :  { %754 = vst [vmem:[#allocation9 + $0x8] sm:$0xff] %v752_v36 }
 0x124   :  { %767 = dma.vmem_to_hbm [thread:$0]  %s760_s24, 256, %s762_s26, [#allocation4], %s947_s25, %s947_s25, %s948_s0  }
 0x125   :  { %942 = dma.done.wait [#allocation4], 256  }
 0x126   :  { %943 = vsyncadd [#allocation4], 4294967040 }
 0x127   :  { %772 = vsyncpa [#allocation3], 1 }
 0x128   :  { %773 = vsyncpa [#allocation4], 1 }
 0x129   :  { %774 = vsyncpa [#allocation5], 1 }
 0x12a   :  { %775 = vsyncpa [#allocation7], 1 }

</bundles_post_ra>
